<compile_context>
chip_gen: v5e
topology: v5e:2x2
jax: 0.10.0
libtpu: 0.0.40
codegen_flags: <defaults>
</compile_context>

<pallas_src>
import jax
import jax.numpy as jnp
from jax.experimental import pallas as pl
from jax.experimental.pallas import tpu as pltpu

EPS = 1e-5        # nn.BatchNorm2d default eps
LANE = 128        # TPU lane width
VMEM_BUDGET = 12 << 20   # conservative per-call working-set budget (bytes)


# ---------------------------------------------------------------------------
# Pallas kernels
# ---------------------------------------------------------------------------
def _matmul_stats_kernel(p_ref, w_ref, y_ref, s_ref):
    """One M-tile of conv-as-matmul (bf16 operands, f32 acc) + BN partials."""
    acc = jnp.dot(p_ref[...], w_ref[...], preferred_element_type=jnp.float32)
    y_ref[...] = acc.astype(y_ref.dtype)                       # bf16 store
    # Per-tile (sum, sum_sq) over rows -- written as two separate row stores.
    s_ref[0, 0:1, :] = jnp.sum(acc, axis=0, keepdims=True)
    s_ref[0, 1:2, :] = jnp.sum(acc * acc, axis=0, keepdims=True)


def _bn_relu_kernel(y_ref, scale_ref, shift_ref, o_ref):
    """relu(y * scale + shift); y stored bf16, math in f32."""
    y = y_ref[...].astype(jnp.float32) * scale_ref[...] + shift_ref[...]
    o_ref[...] = jnp.maximum(y, 0.0).astype(o_ref.dtype)


def _bn_add_relu_kernel(y_ref, sc_ref, sh_ref, r_ref, scr_ref, shr_ref, o_ref):
    """relu((y*sc+sh) + (r*scr+shr)) -- fuses bn2, shortcut-BN and the add."""
    y = y_ref[...].astype(jnp.float32) * sc_ref[...] + sh_ref[...]
    r = r_ref[...].astype(jnp.float32) * scr_ref[...] + shr_ref[...]
    o_ref[...] = jnp.maximum(y + r, 0.0).astype(o_ref.dtype)


# ---------------------------------------------------------------------------
# pallas_call wrappers
# ---------------------------------------------------------------------------
_PARALLEL = pltpu.CompilerParams(dimension_semantics=("parallel",))


def _row_spec(tile_m, cols):
    return pl.BlockSpec((tile_m, cols), lambda i: (i, 0))


def _bcast_spec(cols):
    return pl.BlockSpec((1, cols), lambda i: (0, 0))


def matmul_stats(patches, w, tile_m):
    """patches (Mp, K) bf16 @ w (K, Cp) bf16 -> (y bf16, per-tile (sum, sum_sq) f32)."""
    Mp, K = patches.shape
    Cp = w.shape[1]
    nt = Mp // tile_m
    return pl.pallas_call(
        _matmul_stats_kernel,
        out_shape=(jax.ShapeDtypeStruct((Mp, Cp), jnp.bfloat16),
                   jax.ShapeDtypeStruct((nt, 2, Cp), jnp.float32)),
        grid=(nt,),
        in_specs=[_row_spec(tile_m, K),
                  pl.BlockSpec((K, Cp), lambda i: (0, 0))],     # weights stay resident
        out_specs=(_row_spec(tile_m, Cp),
                   pl.BlockSpec((1, 2, Cp), lambda i: (i, 0, 0))),
        compiler_params=_PARALLEL,
    )(patches, w)


def bn_relu(y, scale, shift, tile_m, out_dtype):
    Mp, Cp = y.shape
    return pl.pallas_call(
        _bn_relu_kernel,
        out_shape=jax.ShapeDtypeStruct((Mp, Cp), out_dtype),
        grid=(Mp // tile_m,),
        in_specs=[_row_spec(tile_m, Cp), _bcast_spec(Cp), _bcast_spec(Cp)],
        out_specs=_row_spec(tile_m, Cp),
        compiler_params=_PARALLEL,
    )(y, scale, shift)


def bn_add_relu(y, scale, shift, resid, scale_r, shift_r, tile_m):
    Mp, Cp = y.shape
    return pl.pallas_call(
        _bn_add_relu_kernel,
        out_shape=jax.ShapeDtypeStruct((Mp, Cp), jnp.float32),
        grid=(Mp // tile_m,),
        in_specs=[_row_spec(tile_m, Cp), _bcast_spec(Cp), _bcast_spec(Cp),
                  _row_spec(tile_m, Cp), _bcast_spec(Cp), _bcast_spec(Cp)],
        out_specs=_row_spec(tile_m, Cp),
        compiler_params=_PARALLEL,
    )(y, scale, shift, resid, scale_r, shift_r)


# ---------------------------------------------------------------------------
# Plain-JAX glue (im2col, padding, BN finalize, parameter setup)
# ---------------------------------------------------------------------------
def _round_up(n, m):
    return (n + m - 1) // m * m


def _pad2d(a, rows, cols):
    return jnp.pad(a, ((0, rows - a.shape[0]), (0, cols - a.shape[1])))


def _pad1d(v, n):
    return jnp.pad(v, (0, n - v.shape[0]))


def _pick_tile(Mp, pref, row_bytes=0, fixed_bytes=0):
    """Largest 128-multiple tile <= pref that divides Mp and fits the VMEM budget."""
    t = max(min(pref, Mp) // LANE * LANE, LANE)
    while t > LANE and (Mp % t != 0 or t * row_bytes + fixed_bytes > VMEM_BUDGET):
        t -= LANE
    return t


def im2col_3x3(x, stride):
    """x: NHWC, 3x3 kernel, padding=1. Returns ((N*Ho*Wo, 9*C), (Ho, Wo))."""
    N, H, W, C = x.shape
    xp = jnp.pad(x, ((0, 0), (1, 1), (1, 1), (0, 0)))
    Ho = (H + 2 - 3) // stride + 1
    Wo = (W + 2 - 3) // stride + 1
    taps = []
    for dy in range(3):
        for dx in range(3):
            taps.append(xp[:, dy:dy + (Ho - 1) * stride + 1:stride,
                           dx:dx + (Wo - 1) * stride + 1:stride, :])
    patches = jnp.stack(taps, axis=3)   # (N, Ho, Wo, 9, C): tap-major, channel-minor
    return patches.reshape(N * Ho * Wo, 9 * C), (Ho, Wo)


def finalize_bn(part_sums, m_true, gamma, beta):
    """Per-tile (sum, sum_sq) partials -> per-channel (scale, shift), all f32.

    var = E[x^2] - mean^2 (clamped >= 0) from f32 sums; padded rows contribute 0
    and we divide by the true M, padded channels have gamma=0 -> scale=shift=0.
    """
    s = jnp.sum(part_sums, axis=0)                          # (2, Cp)
    mean = s[0] / m_true
    var = jnp.maximum(s[1] / m_true - mean * mean, 0.0)
    scale = gamma * jax.lax.rsqrt(var + EPS)
    shift = beta - mean * scale
    return scale.reshape(1, -1), shift.reshape(1, -1)


def init_basic_block_params(key, in_planes, planes, stride):
    """Conv weights in HWIO; BN gamma=1 / beta=0 (fresh nn.BatchNorm2d)."""
    k1, k2, k3 = jax.random.split(key, 3)
    params = {
        "w1": 0.1 * jax.random.normal(k1, (3, 3, in_planes, planes), jnp.float32),
        "g1": jnp.ones((planes,), jnp.float32), "b1": jnp.zeros((planes,), jnp.float32),
        "w2": 0.1 * jax.random.normal(k2, (3, 3, planes, planes), jnp.float32),
        "g2": jnp.ones((planes,), jnp.float32), "b2": jnp.zeros((planes,), jnp.float32),
    }
    if stride != 1 or in_planes != planes:
        params["ws"] = 0.1 * jax.random.normal(k3, (1, 1, in_planes, planes), jnp.float32)
        params["gs"] = jnp.ones((planes,), jnp.float32)
        params["bs"] = jnp.zeros((planes,), jnp.float32)
    return params


def basic_block_forward(x_nchw, params, stride=1, tile_m=512):
    """NCHW in / NCHW out (PyTorch layout); NHWC + flattened (M, C) inside."""
    x = jnp.transpose(x_nchw, (0, 2, 3, 1)).astype(jnp.float32)   # NHWC
    N, H, W, Cin = x.shape
    planes = params["w1"].shape[-1]
    Cp = _round_up(planes, LANE)

    # ---- conv1 (+ bn1 partial stats) ---------------------------------------
    p1, (Ho, Wo) = im2col_3x3(x, stride)              # (M, 9*Cin) f32
    M = N * Ho * Wo
    Mp = _round_up(M, LANE)                           # row pad only to 128
    K1 = _round_up(9 * Cin, LANE)
    tm1 = _pick_tile(Mp, tile_m, row_bytes=4 * (K1 + Cp), fixed_bytes=4 * K1 * Cp)

    p1 = _pad2d(p1, Mp, K1).astype(jnp.bfloat16)
    w1 = _pad2d(params["w1"].reshape(9 * Cin, planes), K1, Cp).astype(jnp.bfloat16)
    y1, part1 = matmul_stats(p1, w1, tm1)             # (Mp, Cp) bf16
    sc1, sh1 = finalize_bn(part1, M, _pad1d(params["g1"], Cp), _pad1d(params["b1"], Cp))

    # ---- bn1 apply + relu (bf16 output feeds conv2; large pointwise tiles) ----
    tm_pw = _pick_tile(Mp, 2048, row_bytes=8 * Cp)
    out1 = bn_relu(y1, sc1, sh1, tm_pw, jnp.bfloat16)  # (Mp, Cp) bf16

    # ---- conv2 (+ bn2 partial stats): patches from true `planes` channels only ----
    K2 = _round_up(9 * planes, LANE)
    p2, _ = im2col_3x3(out1[:M, :planes].reshape(N, Ho, Wo, planes), 1)  # (M, 9*planes) bf16
    p2 = _pad2d(p2, Mp, K2)
    w2 = _pad2d(params["w2"].reshape(9 * planes, planes), K2, Cp).astype(jnp.bfloat16)
    tm2 = _pick_tile(Mp, tile_m, row_bytes=4 * (K2 + Cp), fixed_bytes=4 * K2 * Cp)
    y2, part2 = matmul_stats(p2, w2, tm2)
    sc2, sh2 = finalize_bn(part2, M, _pad1d(params["g2"], Cp), _pad1d(params["b2"], Cp))

    # ---- shortcut -----------------------------------------------------------
    if "ws" in params:   # projection: 1x1 conv (stride) + BN, reuses matmul+stats
        Ks = _round_up(Cin, LANE)
        xs = x[:, ::stride, ::stride, :].reshape(M, Cin)
        xs = _pad2d(xs, Mp, Ks).astype(jnp.bfloat16)
        ws = _pad2d(params["ws"].reshape(Cin, planes), Ks, Cp).astype(jnp.bfloat16)
        tms = _pick_tile(Mp, tile_m, row_bytes=4 * (Ks + Cp), fixed_bytes=4 * Ks * Cp)
        resid, parts = matmul_stats(xs, ws, tms)       # (Mp, Cp) bf16
        scs, shs = finalize_bn(parts, M, _pad1d(params["gs"], Cp), _pad1d(params["bs"], Cp))
    else:                # identity shortcut (stride == 1, in_planes == planes)
        resid = _pad2d(x.reshape(M, Cin), Mp, Cp)      # f32, exact residual
        scs = jnp.ones((1, Cp), jnp.float32)
        shs = jnp.zeros((1, Cp), jnp.float32)

    # ---- bn2 apply + shortcut-BN apply + add + relu (single fused kernel) ----
    tm_pw2 = _pick_tile(Mp, 2048,
                        row_bytes=(4 + 2 * resid.dtype.itemsize + 8) * Cp)
    out = bn_add_relu(y2, sc2, sh2, resid, scs, shs, tm_pw2)   # (Mp, Cp) f32
    out = out[:M, :planes].reshape(N, Ho, Wo, planes)
    return jnp.transpose(out, (0, 3, 1, 2))                    # back to NCHW


# ---------------------------------------------------------------------------
# Plain-JAX reference (training-mode BN batch statistics, like the torch module)
# ---------------------------------------------------------------------------
def reference_forward(x_nchw, params, stride=1,
                      compute_dtype=jnp.float32, store_dtype=jnp.float32):
    """store_dtype mirrors the kernel's bf16 storage of conv outputs (stats in f32)."""
    cd = compute_dtype
    x = jnp.transpose(x_nchw, (0, 2, 3, 1)).astype(jnp.float32)

    def conv(inp, w, s, pad):
        return jax.lax.conv_general_dilated(
            inp.astype(cd), w.astype(cd), (s, s), pad,
            dimension_numbers=("NHWC", "HWIO", "NHWC"),
            preferred_element_type=jnp.float32)

    def bn(y, g, b):
        mu = jnp.mean(y, axis=(0, 1, 2), keepdims=True)
        var = jnp.mean((y - mu) ** 2, axis=(0, 1, 2), keepdims=True)
        ys = y.astype(store_dtype).astype(jnp.float32)   # stats f32, apply on stored y
        return (ys - mu) * jax.lax.rsqrt(var + EPS) * g + b

    out1 = jnp.maximum(bn(conv(x, params["w1"], stride, ((1, 1), (1, 1))),
                          params["g1"], params["b1"]), 0.0)
    out = bn(conv(out1, params["w2"], 1, ((1, 1), (1, 1))),
             params["g2"], params["b2"])
    if "ws" in params:
        sc = bn(conv(x, params["ws"], stride, ((0, 0), (0, 0))),
                params["gs"], params["bs"])
    else:
        sc = x
    return jnp.transpose(jnp.maximum(out + sc, 0.0), (0, 3, 1, 2))


# ---------------------------------------------------------------------------
if __name__ == "__main__":
    key = jax.random.PRNGKey(0)
    forward = jax.jit(basic_block_forward, static_argnames=("stride", "tile_m"))

    configs = [
        # (batch, in_planes, planes, hw, stride)
        (2, 4, 8, 16, 1),    # projection shortcut (in_planes != planes)
        (2, 8, 8, 16, 1),    # identity shortcut
        (2, 4, 8, 16, 2),    # strided + projection shortcut
    ]
    for idx, (batch, in_planes, planes, hw, stride) in enumerate(configs):
        kx, kp = jax.random.split(jax.random.fold_in(key, idx))
        x = jax.random.normal(kx, (batch, in_planes, hw, hw), jnp.float32)  # NCHW
        params = init_basic_block_params(kp, in_planes, planes, stride)

        out = jax.block_until_ready(forward(x, params, stride=stride))
        ho = (hw + 2 - 3) // stride + 1
        assert out.shape == (batch, planes, ho, ho), out.shape

        # Tight check vs. a reference matched to bf16 operands + bf16 y storage ...
        ref_m = reference_forward(x, params, stride,
                                  compute_dtype=jnp.bfloat16, store_dtype=jnp.bfloat16)
        err = float(jnp.max(jnp.abs(out - ref_m)))
        assert err < 5e-2, f"config {idx}: matched max|err| = {err}"
        # ... and a loose sanity check vs. the pure-f32 spec.
        ref_f32 = reference_forward(x, params, stride)
        err32 = float(jnp.max(jnp.abs(out - ref_f32)))
        assert err32 < 0.5, f"config {idx}: f32 max|err| = {err32}"

    print("KERNEL_OK")
</pallas_src>

<mosaic_0001>
module attributes {stable_mosaic.version = 11 : i64} {
  func.func @_matmul_stats_kernel(%arg0: i32, %arg1: memref<512x128xbf16, #tpu.memory_space<vmem>>, %arg2: memref<128x128xbf16, #tpu.memory_space<vmem>>, %arg3: memref<512x128xbf16, #tpu.memory_space<vmem>>, %arg4: memref<1x2x128xf32, #tpu.memory_space<vmem>>) attributes {dimension_semantics = [#tpu.dimension_semantics<parallel>], iteration_bounds = array<i64: 1>, scalar_prefetch = 0 : i64, scratch_operands = 0 : i64, tpu.core_type = #tpu.core_type<tc>, window_params = [{transform_indices = @transform_0, window_bounds = array<i64: 512, 128>}, {pipeline_mode = #tpu.pipeline_mode<synchronous>, transform_indices = @transform_1, window_bounds = array<i64: 128, 128>}, {transform_indices = @transform_2, window_bounds = array<i64: 512, 128>}, {transform_indices = @transform_3, window_bounds = array<i64: 1, 2, 128>}]} {
    %c0 = arith.constant 0 : index
    %c0_0 = arith.constant 0 : index
    %0 = vector.load %arg1[%c0, %c0_0] : memref<512x128xbf16, #tpu.memory_space<vmem>>, vector<512x128xbf16>
    %c0_1 = arith.constant 0 : index
    %c0_2 = arith.constant 0 : index
    %1 = vector.load %arg2[%c0_1, %c0_2] : memref<128x128xbf16, #tpu.memory_space<vmem>>, vector<128x128xbf16>
    %cst = arith.constant dense<0.000000e+00> : vector<512x128xf32>
    %2 = tpu.matmul %0, %1, %cst {dimension_numbers = #tpu.dot_dimension_numbers<[1], [0], [0], [1], [0, 0, 1, 1], [], []>} : vector<512x128xbf16>, vector<128x128xbf16>, vector<512x128xf32> -> vector<512x128xf32>
    %3 = arith.truncf %2 : vector<512x128xf32> to vector<512x128xbf16>
    %c0_3 = arith.constant 0 : index
    %c0_4 = arith.constant 0 : index
    %4 = vector.load %arg3[%c0_3, %c0_4] : memref<512x128xbf16, #tpu.memory_space<vmem>>, vector<512x128xbf16>
    tpu.vector_store %arg3[%c0_3, %c0_4], %3 {strides = array<i32>} : memref<512x128xbf16, #tpu.memory_space<vmem>>, vector<512x128xbf16>,
    %cst_5 = arith.constant dense<0.000000e+00> : vector<128xf32>
    %5 = vector.multi_reduction <add>, %2, %cst_5 [0] : vector<512x128xf32> to vector<128xf32>
    %6 = vector.shape_cast %5 : vector<128xf32> to vector<1x128xf32>
    %c0_6 = arith.constant 0 : index
    %c0_7 = arith.constant 0 : index
    %c0_8 = arith.constant 0 : index
    %7 = vector.load %arg4[%c0_6, %c0_7, %c0_8] : memref<1x2x128xf32, #tpu.memory_space<vmem>>, vector<1x1x128xf32>
    %8 = vector.shape_cast %7 : vector<1x1x128xf32> to vector<1x128xf32>
    %9 = vector.shape_cast %6 : vector<1x128xf32> to vector<1x1x128xf32>
    tpu.vector_store %arg4[%c0_6, %c0_7, %c0_8], %9 {strides = array<i32>} : memref<1x2x128xf32, #tpu.memory_space<vmem>>, vector<1x1x128xf32>,
    %10 = arith.mulf %2, %2 : vector<512x128xf32>
    %cst_9 = arith.constant dense<0.000000e+00> : vector<128xf32>
    %11 = vector.multi_reduction <add>, %10, %cst_9 [0] : vector<512x128xf32> to vector<128xf32>
    %12 = vector.shape_cast %11 : vector<128xf32> to vector<1x128xf32>
    %c0_10 = arith.constant 0 : index
    %c1 = arith.constant 1 : index
    %c0_11 = arith.constant 0 : index
    %13 = vector.load %arg4[%c0_10, %c1, %c0_11] : memref<1x2x128xf32, #tpu.memory_space<vmem>>, vector<1x1x128xf32>
    %14 = vector.shape_cast %13 : vector<1x1x128xf32> to vector<1x128xf32>
    %15 = vector.shape_cast %12 : vector<1x128xf32> to vector<1x1x128xf32>
    tpu.vector_store %arg4[%c0_10, %c1, %c0_11], %15 {strides = array<i32>} : memref<1x2x128xf32, #tpu.memory_space<vmem>>, vector<1x1x128xf32>,
    return
  }
  func.func @transform_0(%arg0: i32) -> (i32, i32) {
    %c0_i32 = arith.constant 0 : i32
    %c0_i32_0 = arith.constant 0 : i32
    return %arg0, %c0_i32 : i32, i32
  }
  func.func @transform_1(%arg0: i32) -> (i32, i32) {
    %c0_i32 = arith.constant 0 : i32
    %c0_i32_0 = arith.constant 0 : i32
    %c0_i32_1 = arith.constant 0 : i32
    return %c0_i32, %c0_i32_0 : i32, i32
  }
  func.func @transform_2(%arg0: i32) -> (i32, i32) {
    %c0_i32 = arith.constant 0 : i32
    %c0_i32_0 = arith.constant 0 : i32
    return %arg0, %c0_i32 : i32, i32
  }
  func.func @transform_3(%arg0: i32) -> (i32, i32, i32) {
    %c0_i32 = arith.constant 0 : i32
    %c0_i32_0 = arith.constant 0 : i32
    %c0_i32_1 = arith.constant 0 : i32
    return %arg0, %c0_i32, %c0_i32_0 : i32, i32, i32
  }
}

module attributes {stable_mosaic.version = 11 : i64} {
  func.func @_bn_relu_kernel(%arg0: i32, %arg1: memref<512x128xbf16, #tpu.memory_space<vmem>>, %arg2: memref<1x128xf32, #tpu.memory_space<vmem>>, %arg3: memref<1x128xf32, #tpu.memory_space<vmem>>, %arg4: memref<512x128xbf16, #tpu.memory_space<vmem>>) attributes {dimension_semantics = [#tpu.dimension_semantics<parallel>], iteration_bounds = array<i64: 1>, scalar_prefetch = 0 : i64, scratch_operands = 0 : i64, tpu.core_type = #tpu.core_type<tc>, window_params = [{transform_indices = @transform_0, window_bounds = array<i64: 512, 128>}, {pipeline_mode = #tpu.pipeline_mode<synchronous>, transform_indices = @transform_1, window_bounds = array<i64: 1, 128>}, {pipeline_mode = #tpu.pipeline_mode<synchronous>, transform_indices = @transform_2, window_bounds = array<i64: 1, 128>}, {transform_indices = @transform_3, window_bounds = array<i64: 512, 128>}]} {
    %c0 = arith.constant 0 : index
    %c0_0 = arith.constant 0 : index
    %0 = vector.load %arg1[%c0, %c0_0] : memref<512x128xbf16, #tpu.memory_space<vmem>>, vector<512x128xbf16>
    %1 = arith.extf %0 : vector<512x128xbf16> to vector<512x128xf32>
    %c0_1 = arith.constant 0 : index
    %c0_2 = arith.constant 0 : index
    %2 = vector.load %arg2[%c0_1, %c0_2] : memref<1x128xf32, #tpu.memory_space<vmem>>, vector<1x128xf32>
    %3 = vector.broadcast %2 : vector<1x128xf32> to vector<512x128xf32>
    %4 = arith.mulf %1, %3 : vector<512x128xf32>
    %c0_3 = arith.constant 0 : index
    %c0_4 = arith.constant 0 : index
    %5 = vector.load %arg3[%c0_3, %c0_4] : memref<1x128xf32, #tpu.memory_space<vmem>>, vector<1x128xf32>
    %6 = vector.broadcast %5 : vector<1x128xf32> to vector<512x128xf32>
    %7 = arith.addf %4, %6 : vector<512x128xf32>
    %cst = arith.constant 0.000000e+00 : f32
    %8 = vector.broadcast %cst : f32 to vector<512x128xf32>
    %9 = arith.maximumf %7, %8 : vector<512x128xf32>
    %10 = arith.truncf %9 : vector<512x128xf32> to vector<512x128xbf16>
    %c0_5 = arith.constant 0 : index
    %c0_6 = arith.constant 0 : index
    %11 = vector.load %arg4[%c0_5, %c0_6] : memref<512x128xbf16, #tpu.memory_space<vmem>>, vector<512x128xbf16>
    tpu.vector_store %arg4[%c0_5, %c0_6], %10 {strides = array<i32>} : memref<512x128xbf16, #tpu.memory_space<vmem>>, vector<512x128xbf16>,
    return
  }
  func.func @transform_0(%arg0: i32) -> (i32, i32) {
    %c0_i32 = arith.constant 0 : i32
    %c0_i32_0 = arith.constant 0 : i32
    return %arg0, %c0_i32 : i32, i32
  }
  func.func @transform_1(%arg0: i32) -> (i32, i32) {
    %c0_i32 = arith.constant 0 : i32
    %c0_i32_0 = arith.constant 0 : i32
    %c0_i32_1 = arith.constant 0 : i32
    return %c0_i32, %c0_i32_0 : i32, i32
  }
  func.func @transform_2(%arg0: i32) -> (i32, i32) {
    %c0_i32 = arith.constant 0 : i32
    %c0_i32_0 = arith.constant 0 : i32
    %c0_i32_1 = arith.constant 0 : i32
    return %c0_i32, %c0_i32_0 : i32, i32
  }
  func.func @transform_3(%arg0: i32) -> (i32, i32) {
    %c0_i32 = arith.constant 0 : i32
    %c0_i32_0 = arith.constant 0 : i32
    return %arg0, %c0_i32 : i32, i32
  }
}

module attributes {stable_mosaic.version = 11 : i64} {
  func.func @_bn_add_relu_kernel(%arg0: i32, %arg1: memref<512x128xbf16, #tpu.memory_space<vmem>>, %arg2: memref<1x128xf32, #tpu.memory_space<vmem>>, %arg3: memref<1x128xf32, #tpu.memory_space<vmem>>, %arg4: memref<512x128xbf16, #tpu.memory_space<vmem>>, %arg5: memref<1x128xf32, #tpu.memory_space<vmem>>, %arg6: memref<1x128xf32, #tpu.memory_space<vmem>>, %arg7: memref<512x128xf32, #tpu.memory_space<vmem>>) attributes {dimension_semantics = [#tpu.dimension_semantics<parallel>], iteration_bounds = array<i64: 1>, scalar_prefetch = 0 : i64, scratch_operands = 0 : i64, tpu.core_type = #tpu.core_type<tc>, window_params = [{transform_indices = @transform_0, window_bounds = array<i64: 512, 128>}, {pipeline_mode = #tpu.pipeline_mode<synchronous>, transform_indices = @transform_1, window_bounds = array<i64: 1, 128>}, {pipeline_mode = #tpu.pipeline_mode<synchronous>, transform_indices = @transform_2, window_bounds = array<i64: 1, 128>}, {transform_indices = @transform_3, window_bounds = array<i64: 512, 128>}, {pipeline_mode = #tpu.pipeline_mode<synchronous>, transform_indices = @transform_4, window_bounds = array<i64: 1, 128>}, {pipeline_mode = #tpu.pipeline_mode<synchronous>, transform_indices = @transform_5, window_bounds = array<i64: 1, 128>}, {transform_indices = @transform_6, window_bounds = array<i64: 512, 128>}]} {
    %c0 = arith.constant 0 : index
    %c0_0 = arith.constant 0 : index
    %0 = vector.load %arg1[%c0, %c0_0] : memref<512x128xbf16, #tpu.memory_space<vmem>>, vector<512x128xbf16>
    %1 = arith.extf %0 : vector<512x128xbf16> to vector<512x128xf32>
    %c0_1 = arith.constant 0 : index
    %c0_2 = arith.constant 0 : index
    %2 = vector.load %arg2[%c0_1, %c0_2] : memref<1x128xf32, #tpu.memory_space<vmem>>, vector<1x128xf32>
    %3 = vector.broadcast %2 : vector<1x128xf32> to vector<512x128xf32>
    %4 = arith.mulf %1, %3 : vector<512x128xf32>
    %c0_3 = arith.constant 0 : index
    %c0_4 = arith.constant 0 : index
    %5 = vector.load %arg3[%c0_3, %c0_4] : memref<1x128xf32, #tpu.memory_space<vmem>>, vector<1x128xf32>
    %6 = vector.broadcast %5 : vector<1x128xf32> to vector<512x128xf32>
    %7 = arith.addf %4, %6 : vector<512x128xf32>
    %c0_5 = arith.constant 0 : index
    %c0_6 = arith.constant 0 : index
    %8 = vector.load %arg4[%c0_5, %c0_6] : memref<512x128xbf16, #tpu.memory_space<vmem>>, vector<512x128xbf16>
    %9 = arith.extf %8 : vector<512x128xbf16> to vector<512x128xf32>
    %c0_7 = arith.constant 0 : index
    %c0_8 = arith.constant 0 : index
    %10 = vector.load %arg5[%c0_7, %c0_8] : memref<1x128xf32, #tpu.memory_space<vmem>>, vector<1x128xf32>
    %11 = vector.broadcast %10 : vector<1x128xf32> to vector<512x128xf32>
    %12 = arith.mulf %9, %11 : vector<512x128xf32>
    %c0_9 = arith.constant 0 : index
    %c0_10 = arith.constant 0 : index
    %13 = vector.load %arg6[%c0_9, %c0_10] : memref<1x128xf32, #tpu.memory_space<vmem>>, vector<1x128xf32>
    %14 = vector.broadcast %13 : vector<1x128xf32> to vector<512x128xf32>
    %15 = arith.addf %12, %14 : vector<512x128xf32>
    %16 = arith.addf %7, %15 : vector<512x128xf32>
    %cst = arith.constant 0.000000e+00 : f32
    %17 = vector.broadcast %cst : f32 to vector<512x128xf32>
    %18 = arith.maximumf %16, %17 : vector<512x128xf32>
    %c0_11 = arith.constant 0 : index
    %c0_12 = arith.constant 0 : index
    %19 = vector.load %arg7[%c0_11, %c0_12] : memref<512x128xf32, #tpu.memory_space<vmem>>, vector<512x128xf32>
    tpu.vector_store %arg7[%c0_11, %c0_12], %18 {strides = array<i32>} : memref<512x128xf32, #tpu.memory_space<vmem>>, vector<512x128xf32>,
    return
  }
  func.func @transform_0(%arg0: i32) -> (i32, i32) {
    %c0_i32 = arith.constant 0 : i32
    %c0_i32_0 = arith.constant 0 : i32
    return %arg0, %c0_i32 : i32, i32
  }
  func.func @transform_1(%arg0: i32) -> (i32, i32) {
    %c0_i32 = arith.constant 0 : i32
    %c0_i32_0 = arith.constant 0 : i32
    %c0_i32_1 = arith.constant 0 : i32
    return %c0_i32, %c0_i32_0 : i32, i32
  }
  func.func @transform_2(%arg0: i32) -> (i32, i32) {
    %c0_i32 = arith.constant 0 : i32
    %c0_i32_0 = arith.constant 0 : i32
    %c0_i32_1 = arith.constant 0 : i32
    return %c0_i32, %c0_i32_0 : i32, i32
  }
  func.func @transform_3(%arg0: i32) -> (i32, i32) {
    %c0_i32 = arith.constant 0 : i32
    %c0_i32_0 = arith.constant 0 : i32
    return %arg0, %c0_i32 : i32, i32
  }
  func.func @transform_4(%arg0: i32) -> (i32, i32) {
    %c0_i32 = arith.constant 0 : i32
    %c0_i32_0 = arith.constant 0 : i32
    %c0_i32_1 = arith.constant 0 : i32
    return %c0_i32, %c0_i32_0 : i32, i32
  }
  func.func @transform_5(%arg0: i32) -> (i32, i32) {
    %c0_i32 = arith.constant 0 : i32
    %c0_i32_0 = arith.constant 0 : i32
    %c0_i32_1 = arith.constant 0 : i32
    return %c0_i32, %c0_i32_0 : i32, i32
  }
  func.func @transform_6(%arg0: i32) -> (i32, i32) {
    %c0_i32 = arith.constant 0 : i32
    %c0_i32_0 = arith.constant 0 : i32
    return %arg0, %c0_i32 : i32, i32
  }
}

</mosaic_0001>

<bundles_post_ra>
// kernel: basic_block_forward.6
= control target key start
LH: loop header
LB: loop body
LE: loop exit
PB: predicated region body
PF: predicated region fallthrough
CT: control target
= control target key end

     0   :  { %s1176_s0 = inlined_call_operand.vmem [shape: bf16[512,128], index: 0, kind: input, shape index: {}]   ;;  %s1177_s1 = inlined_call_operand.vmem [shape: f32[1,128], index: 1, kind: input, shape index: {}]   ;;  %s1178_s2 = inlined_call_operand.vmem [shape: f32[1,128], index: 2, kind: input, shape index: {}]   ;;  %s1179_s3 = inlined_call_operand.vmem [shape: bf16[512,128], index: 3, kind: output, shape index: {}]  }
   0x1   :  { %v475_v0 = vld [vmem:[%s1176_s0] sm:$0xff]   ;;  %v762_v5 = vld [vmem:[%s1176_s0 + $0x8] sm:$0xff]   ;;  %v763_v8 = vld [vmem:[%s1176_s0 + $0x10] sm:$0xff]  }
   0x2   :  { %v852_v1 = vld [vmem:[%s1177_s1] ss:$0 sm:$0xff]  ;;  %v476_v2 = vunpack.c.l.bf16 %v475_v0  ;;  %v477_v3 = vunpack.c.h.bf16 %v475_v0  ;;  %v480_v6 = vunpack.c.l.bf16 %v762_v5  ;;  %v481_v7 = vunpack.c.h.bf16 %v762_v5  ;;  %v764_v9 = vld [vmem:[%s1176_s0 + $0x18] sm:$0xff]   ;;  %v766_v35 = vld [vmem:[%s1176_s0 + $0x28] sm:$0xff]  }
   0x3   :  { %v857_v4 = vld [vmem:[%s1178_s2] ss:$0 sm:$0xff]  ;;  %v484_v12 = vunpack.c.l.bf16 %v763_v8  ;;  %v485_v13 = vunpack.c.h.bf16 %v763_v8  ;;  %v488_v16 = vunpack.c.l.bf16 %v764_v9  ;;  %v489_v17 = vunpack.c.h.bf16 %v764_v9  ;;  %v767_v40 = vld [vmem:[%s1176_s0 + $0x30] sm:$0xff]   ;;  %v768_v45 = vld [vmem:[%s1176_s0 + $0x38] sm:$0xff]  }
   0x4   :  { %v146_v10 = vmul.f32 %v852_v1, %v476_v2  ;;  %v147_v11 = vmul.f32 %v852_v1, %v477_v3  ;;  %v148_v14 = vmul.f32 %v852_v1, %v480_v6  ;;  %v149_v15 = vmul.f32 %v852_v1, %v481_v7  ;;  %v765_v26 = vld [vmem:[%s1176_s0 + $0x20] sm:$0xff]  }
   0x5   :  { %v150_v20 = vmul.f32 %v852_v1, %v484_v12  ;;  %v151_v21 = vmul.f32 %v852_v1, %v485_v13  ;;  %v152_v24 = vmul.f32 %v852_v1, %v488_v16  ;;  %v153_v25 = vmul.f32 %v852_v1, %v489_v17  ;;  %v769_v62 = vld [vmem:[%s1176_s0 + $0x40] sm:$0xff]   ;;  %v770_v13 = vld [vmem:[%s1176_s0 + $0x48] sm:$0xff]  }
   0x6   :  { %v214_v18 = vadd.f32 %v857_v4, %v146_v10  ;;  %v215_v19 = vadd.f32 %v857_v4, %v147_v11  ;;  %v216_v22 = vadd.f32 %v857_v4, %v148_v14  ;;  %v217_v23 = vadd.f32 %v857_v4, %v149_v15 }
   0x7   :  { %v218_v29 = vadd.f32 %v857_v4, %v150_v20  ;;  %v219_v30 = vadd.f32 %v857_v4, %v151_v21  ;;  %v220_v33 = vadd.f32 %v857_v4, %v152_v24  ;;  %v221_v34 = vadd.f32 %v857_v4, %v153_v25 }
   0x8   :  { %v278_v27 = vmax.f32 %v214_v18, 0.0  ;;  %v279_v28 = vmax.f32 %v215_v19, 0.0  ;;  %v280_v31 = vmax.f32 %v216_v22, 0.0  ;;  %v281_v32 = vmax.f32 %v217_v23, 0.0  ;;  %v771_v18 = vld [vmem:[%s1176_s0 + $0x50] sm:$0xff]   ;;  %v772_v23 = vld [vmem:[%s1176_s0 + $0x58] sm:$0xff]  }
   0x9   :  { %v282_v37 = vmax.f32 %v218_v29, 0.0  ;;  %v283_v38 = vmax.f32 %v219_v30, 0.0  ;;  %v492_v39 = vunpack.c.l.bf16 %v765_v26  ;;  %v284_v42 = vmax.f32 %v220_v33, 0.0 }
   0xa   :  { %v605_v36 = vpack.c.bf16 %v279_v28, %v278_v27  ;;  %v610_v41 = vpack.c.bf16 %v281_v32, %v280_v31  ;;  %v285_v43 = vmax.f32 %v221_v34, 0.0  ;;  %v493_v44 = vunpack.c.h.bf16 %v765_v26 }
   0xb   :  { %v615_v46 = vpack.c.bf16 %v283_v38, %v282_v37  ;;  %v154_v47 = vmul.f32 %v852_v1, %v492_v39  ;;  %v496_v48 = vunpack.c.l.bf16 %v766_v35  ;;  %v497_v49 = vunpack.c.h.bf16 %v766_v35 }
   0xc   :  { %606 = vst [vmem:[%s1179_s3] sm:$0xff] %v605_v36   ;;  %v620_v50 = vpack.c.bf16 %v285_v43, %v284_v42  ;;  %v155_v51 = vmul.f32 %v852_v1, %v493_v44  ;;  %v500_v52 = vunpack.c.l.bf16 %v767_v40  ;;  %v501_v53 = vunpack.c.h.bf16 %v767_v40  ;;  %v773_v36 = vld [vmem:[%s1176_s0 + $0x60] sm:$0xff]  }
   0xd   :  { %793 = vst [vmem:[%s1179_s3 + $0x8] sm:$0xff] %v610_v41   ;;  %v222_v54 = vadd.f32 %v857_v4, %v154_v47  ;;  %v156_v55 = vmul.f32 %v852_v1, %v496_v48  ;;  %v157_v56 = vmul.f32 %v852_v1, %v497_v49  ;;  %v504_v57 = vunpack.c.l.bf16 %v768_v45 }
   0xe   :  { %794 = vst [vmem:[%s1179_s3 + $0x10] sm:$0xff] %v615_v46   ;;  %v223_v58 = vadd.f32 %v857_v4, %v155_v51  ;;  %v158_v59 = vmul.f32 %v852_v1, %v500_v52  ;;  %v159_v60 = vmul.f32 %v852_v1, %v501_v53  ;;  %v505_v61 = vunpack.c.h.bf16 %v768_v45  ;;  %v774_v53 = vld [vmem:[%s1176_s0 + $0x68] sm:$0xff]  }
   0xf   :  { %795 = vst [vmem:[%s1179_s3 + $0x18] sm:$0xff] %v620_v50   ;;  %v286_v63 = vmax.f32 %v222_v54, 0.0  ;;  %v224_v0 = vadd.f32 %v857_v4, %v156_v55  ;;  %v225_v2 = vadd.f32 %v857_v4, %v157_v56  ;;  %v160_v3 = vmul.f32 %v852_v1, %v504_v57 }
  0x10   :  { %v287_v5 = vmax.f32 %v223_v58, 0.0  ;;  %v226_v6 = vadd.f32 %v857_v4, %v158_v59  ;;  %v227_v7 = vadd.f32 %v857_v4, %v159_v60  ;;  %v161_v8 = vmul.f32 %v852_v1, %v505_v61  ;;  %v775_v58 = vld [vmem:[%s1176_s0 + $0x70] sm:$0xff]  }
  0x11   :  { %v288_v9 = vmax.f32 %v224_v0, 0.0  ;;  %v289_v10 = vmax.f32 %v225_v2, 0.0  ;;  %v228_v11 = vadd.f32 %v857_v4, %v160_v3  ;;  %v508_v12 = vunpack.c.l.bf16 %v769_v62 }
  0x12   :  { %v625_v14 = vpack.c.bf16 %v287_v5, %v286_v63  ;;  %v290_v15 = vmax.f32 %v226_v6, 0.0  ;;  %v291_v16 = vmax.f32 %v227_v7, 0.0  ;;  %v229_v17 = vadd.f32 %v857_v4, %v161_v8  ;;  %v776_v63 = vld [vmem:[%s1176_s0 + $0x78] sm:$0xff]  }
  0x13   :  { %v630_v19 = vpack.c.bf16 %v289_v10, %v288_v9  ;;  %v292_v20 = vmax.f32 %v228_v11, 0.0  ;;  %v509_v21 = vunpack.c.h.bf16 %v769_v62  ;;  %v162_v22 = vmul.f32 %v852_v1, %v508_v12 }
  0x14   :  { %796 = vst [vmem:[%s1179_s3 + $0x20] sm:$0xff] %v625_v14   ;;  %v635_v24 = vpack.c.bf16 %v291_v16, %v290_v15  ;;  %v293_v25 = vmax.f32 %v229_v17, 0.0  ;;  %v512_v26 = vunpack.c.l.bf16 %v770_v13  ;;  %v513_v27 = vunpack.c.h.bf16 %v770_v13  ;;  %v777_v14 = vld [vmem:[%s1176_s0 + $0x80] sm:$0xff]  }
  0x15   :  { %797 = vst [vmem:[%s1179_s3 + $0x28] sm:$0xff] %v630_v19   ;;  %v163_v28 = vmul.f32 %v852_v1, %v509_v21  ;;  %v230_v29 = vadd.f32 %v857_v4, %v162_v22  ;;  %v516_v30 = vunpack.c.l.bf16 %v771_v18  ;;  %v517_v31 = vunpack.c.h.bf16 %v771_v18 }
  0x16   :  { %798 = vst [vmem:[%s1179_s3 + $0x30] sm:$0xff] %v635_v24   ;;  %v640_v32 = vpack.c.bf16 %v293_v25, %v292_v20  ;;  %v164_v33 = vmul.f32 %v852_v1, %v512_v26  ;;  %v165_v34 = vmul.f32 %v852_v1, %v513_v27  ;;  %v520_v35 = vunpack.c.l.bf16 %v772_v23  ;;  %v778_v27 = vld [vmem:[%s1176_s0 + $0x88] sm:$0xff]  }
  0x17   :  { %v231_v37 = vadd.f32 %v857_v4, %v163_v28  ;;  %v294_v38 = vmax.f32 %v230_v29, 0.0  ;;  %v166_v39 = vmul.f32 %v852_v1, %v516_v30  ;;  %v167_v40 = vmul.f32 %v852_v1, %v517_v31 }
  0x18   :  { %799 = vst [vmem:[%s1179_s3 + $0x38] sm:$0xff] %v640_v32   ;;  %v232_v41 = vadd.f32 %v857_v4, %v164_v33  ;;  %v233_v42 = vadd.f32 %v857_v4, %v165_v34  ;;  %v521_v43 = vunpack.c.h.bf16 %v772_v23  ;;  %v168_v44 = vmul.f32 %v852_v1, %v520_v35 }
  0x19   :  { %v295_v45 = vmax.f32 %v231_v37, 0.0  ;;  %v234_v46 = vadd.f32 %v857_v4, %v166_v39  ;;  %v235_v47 = vadd.f32 %v857_v4, %v167_v40  ;;  %v524_v48 = vunpack.c.l.bf16 %v773_v36 }
  0x1a   :  { %v296_v49 = vmax.f32 %v232_v41, 0.0  ;;  %v297_v50 = vmax.f32 %v233_v42, 0.0  ;;  %v169_v51 = vmul.f32 %v852_v1, %v521_v43  ;;  %v236_v52 = vadd.f32 %v857_v4, %v168_v44  ;;  %v780_v41 = vld [vmem:[%s1176_s0 + $0x98] sm:$0xff]  }
  0x1b   :  { %v645_v54 = vpack.c.bf16 %v295_v45, %v294_v38  ;;  %v298_v55 = vmax.f32 %v234_v46, 0.0  ;;  %v299_v56 = vmax.f32 %v235_v47, 0.0  ;;  %v525_v57 = vunpack.c.h.bf16 %v773_v36  ;;  %v779_v36 = vld [vmem:[%s1176_s0 + $0x90] sm:$0xff]  }
  0x1c   :  { %v650_v59 = vpack.c.bf16 %v297_v50, %v296_v49  ;;  %v237_v60 = vadd.f32 %v857_v4, %v169_v51  ;;  %v300_v61 = vmax.f32 %v236_v52, 0.0  ;;  %v170_v62 = vmul.f32 %v852_v1, %v524_v48 }
  0x1d   :  { %800 = vst [vmem:[%s1179_s3 + $0x40] sm:$0xff] %v645_v54   ;;  %v655_v0 = vpack.c.bf16 %v299_v56, %v298_v55  ;;  %v171_v2 = vmul.f32 %v852_v1, %v525_v57  ;;  %v528_v3 = vunpack.c.l.bf16 %v774_v53  ;;  %v529_v5 = vunpack.c.h.bf16 %v774_v53  ;;  %v781_v54 = vld [vmem:[%s1176_s0 + $0xa0] sm:$0xff]  }
  0x1e   :  { %801 = vst [vmem:[%s1179_s3 + $0x48] sm:$0xff] %v650_v59   ;;  %v301_v6 = vmax.f32 %v237_v60, 0.0  ;;  %v238_v7 = vadd.f32 %v857_v4, %v170_v62  ;;  %v532_v8 = vunpack.c.l.bf16 %v775_v58  ;;  %v533_v9 = vunpack.c.h.bf16 %v775_v58 }
  0x1f   :  { %802 = vst [vmem:[%s1179_s3 + $0x50] sm:$0xff] %v655_v0   ;;  %v239_v10 = vadd.f32 %v857_v4, %v171_v2  ;;  %v172_v11 = vmul.f32 %v852_v1, %v528_v3  ;;  %v173_v12 = vmul.f32 %v852_v1, %v529_v5  ;;  %v536_v13 = vunpack.c.l.bf16 %v776_v63  ;;  %v782_v5 = vld [vmem:[%s1176_s0 + $0xa8] sm:$0xff]  }
  0x20   :  { %v660_v15 = vpack.c.bf16 %v301_v6, %v300_v61  ;;  %v302_v16 = vmax.f32 %v238_v7, 0.0  ;;  %v174_v17 = vmul.f32 %v852_v1, %v532_v8  ;;  %v175_v18 = vmul.f32 %v852_v1, %v533_v9 }
  0x21   :  { %v303_v19 = vmax.f32 %v239_v10, 0.0  ;;  %v240_v20 = vadd.f32 %v857_v4, %v172_v11  ;;  %v241_v21 = vadd.f32 %v857_v4, %v173_v12  ;;  %v537_v22 = vunpack.c.h.bf16 %v776_v63 }
  0x22   :  { %803 = vst [vmem:[%s1179_s3 + $0x58] sm:$0xff] %v660_v15   ;;  %v242_v23 = vadd.f32 %v857_v4, %v174_v17  ;;  %v243_v24 = vadd.f32 %v857_v4, %v175_v18  ;;  %v176_v25 = vmul.f32 %v852_v1, %v536_v13  ;;  %v540_v26 = vunpack.c.l.bf16 %v777_v14 }
  0x23   :  { %v665_v28 = vpack.c.bf16 %v303_v19, %v302_v16  ;;  %v304_v29 = vmax.f32 %v240_v20, 0.0  ;;  %v305_v30 = vmax.f32 %v241_v21, 0.0  ;;  %v177_v31 = vmul.f32 %v852_v1, %v537_v22 }
  0x24   :  { %v306_v32 = vmax.f32 %v242_v23, 0.0  ;;  %v307_v33 = vmax.f32 %v243_v24, 0.0  ;;  %v244_v34 = vadd.f32 %v857_v4, %v176_v25  ;;  %v541_v35 = vunpack.c.h.bf16 %v777_v14  ;;  %v783_v14 = vld [vmem:[%s1176_s0 + $0xb0] sm:$0xff]   ;;  %v784_v23 = vld [vmem:[%s1176_s0 + $0xb8] sm:$0xff]  }
  0x25   :  { %804 = vst [vmem:[%s1179_s3 + $0x60] sm:$0xff] %v665_v28   ;;  %v670_v37 = vpack.c.bf16 %v305_v30, %v304_v29  ;;  %v245_v38 = vadd.f32 %v857_v4, %v177_v31  ;;  %v178_v39 = vmul.f32 %v852_v1, %v540_v26  ;;  %v544_v40 = vunpack.c.l.bf16 %v778_v27 }
  0x26   :  { %v675_v42 = vpack.c.bf16 %v307_v33, %v306_v32  ;;  %v308_v43 = vmax.f32 %v244_v34, 0.0  ;;  %v179_v44 = vmul.f32 %v852_v1, %v541_v35  ;;  %v545_v45 = vunpack.c.h.bf16 %v778_v27  ;;  %v785_v32 = vld [vmem:[%s1176_s0 + $0xc0] sm:$0xff]  }
  0x27   :  { %805 = vst [vmem:[%s1179_s3 + $0x68] sm:$0xff] %v670_v37   ;;  %v309_v46 = vmax.f32 %v245_v38, 0.0  ;;  %v246_v47 = vadd.f32 %v857_v4, %v178_v39  ;;  %v180_v48 = vmul.f32 %v852_v1, %v544_v40  ;;  %v548_v49 = vunpack.c.l.bf16 %v779_v36 }
  0x28   :  { %806 = vst [vmem:[%s1179_s3 + $0x70] sm:$0xff] %v675_v42   ;;  %v247_v50 = vadd.f32 %v857_v4, %v179_v44  ;;  %v181_v51 = vmul.f32 %v852_v1, %v545_v45  ;;  %v549_v52 = vunpack.c.h.bf16 %v779_v36  ;;  %v552_v53 = vunpack.c.l.bf16 %v780_v41  ;;  %v786_v45 = vld [vmem:[%s1176_s0 + $0xc8] sm:$0xff]  }
  0x29   :  { %v680_v55 = vpack.c.bf16 %v309_v46, %v308_v43  ;;  %v310_v56 = vmax.f32 %v246_v47, 0.0  ;;  %v248_v57 = vadd.f32 %v857_v4, %v180_v48  ;;  %v182_v58 = vmul.f32 %v852_v1, %v548_v49 }
  0x2a   :  { %v311_v59 = vmax.f32 %v247_v50, 0.0  ;;  %v249_v60 = vadd.f32 %v857_v4, %v181_v51  ;;  %v183_v61 = vmul.f32 %v852_v1, %v549_v52  ;;  %v553_v62 = vunpack.c.h.bf16 %v780_v41 }
  0x2b   :  { %807 = vst [vmem:[%s1179_s3 + $0x78] sm:$0xff] %v680_v55   ;;  %v312_v63 = vmax.f32 %v248_v57, 0.0  ;;  %v250_v0 = vadd.f32 %v857_v4, %v182_v58  ;;  %v184_v2 = vmul.f32 %v852_v1, %v552_v53  ;;  %v556_v3 = vunpack.c.l.bf16 %v781_v54 }
  0x2c   :  { %v685_v6 = vpack.c.bf16 %v311_v59, %v310_v56  ;;  %v313_v7 = vmax.f32 %v249_v60, 0.0  ;;  %v251_v8 = vadd.f32 %v857_v4, %v183_v61  ;;  %v185_v9 = vmul.f32 %v852_v1, %v553_v62 }
  0x2d   :  { %v314_v10 = vmax.f32 %v250_v0, 0.0  ;;  %v252_v11 = vadd.f32 %v857_v4, %v184_v2  ;;  %v557_v12 = vunpack.c.h.bf16 %v781_v54  ;;  %v186_v13 = vmul.f32 %v852_v1, %v556_v3  ;;  %v787_v54 = vld [vmem:[%s1176_s0 + $0xd0] sm:$0xff]  }
  0x2e   :  { %808 = vst [vmem:[%s1179_s3 + $0x80] sm:$0xff] %v685_v6   ;;  %v690_v15 = vpack.c.bf16 %v313_v7, %v312_v63  ;;  %v315_v16 = vmax.f32 %v251_v8, 0.0  ;;  %v253_v17 = vadd.f32 %v857_v4, %v185_v9  ;;  %v560_v18 = vunpack.c.l.bf16 %v782_v5  ;;  %v788_v63 = vld [vmem:[%s1176_s0 + $0xd8] sm:$0xff]  }
  0x2f   :  { %v316_v19 = vmax.f32 %v252_v11, 0.0  ;;  %v187_v20 = vmul.f32 %v852_v1, %v557_v12  ;;  %v254_v21 = vadd.f32 %v857_v4, %v186_v13  ;;  %v561_v22 = vunpack.c.h.bf16 %v782_v5 }
  0x30   :  { %809 = vst [vmem:[%s1179_s3 + $0x88] sm:$0xff] %v690_v15   ;;  %v695_v24 = vpack.c.bf16 %v315_v16, %v314_v10  ;;  %v317_v25 = vmax.f32 %v253_v17, 0.0  ;;  %v188_v26 = vmul.f32 %v852_v1, %v560_v18  ;;  %v564_v27 = vunpack.c.l.bf16 %v783_v14  ;;  %v789_v10 = vld [vmem:[%s1176_s0 + $0xe0] sm:$0xff]  }
  0x31   :  { %v255_v28 = vadd.f32 %v857_v4, %v187_v20  ;;  %v318_v29 = vmax.f32 %v254_v21, 0.0  ;;  %v189_v30 = vmul.f32 %v852_v1, %v561_v22  ;;  %v565_v31 = vunpack.c.h.bf16 %v783_v14 }
  0x32   :  { %810 = vst [vmem:[%s1179_s3 + $0x90] sm:$0xff] %v695_v24   ;;  %v700_v33 = vpack.c.bf16 %v317_v25, %v316_v19  ;;  %v256_v34 = vadd.f32 %v857_v4, %v188_v26  ;;  %v190_v35 = vmul.f32 %v852_v1, %v564_v27  ;;  %v568_v36 = vunpack.c.l.bf16 %v784_v23 }
  0x33   :  { %v319_v37 = vmax.f32 %v255_v28, 0.0  ;;  %v257_v38 = vadd.f32 %v857_v4, %v189_v30  ;;  %v191_v39 = vmul.f32 %v852_v1, %v565_v31  ;;  %v569_v40 = vunpack.c.h.bf16 %v784_v23  ;;  %v790_v23 = vld [vmem:[%s1176_s0 + $0xe8] sm:$0xff]  }
  0x34   :  { %811 = vst [vmem:[%s1179_s3 + $0x98] sm:$0xff] %v700_v33   ;;  %v320_v41 = vmax.f32 %v256_v34, 0.0  ;;  %v258_v42 = vadd.f32 %v857_v4, %v190_v35  ;;  %v192_v43 = vmul.f32 %v852_v1, %v568_v36  ;;  %v572_v44 = vunpack.c.l.bf16 %v785_v32 }
  0x35   :  { %v705_v46 = vpack.c.bf16 %v319_v37, %v318_v29  ;;  %v321_v47 = vmax.f32 %v257_v38, 0.0  ;;  %v259_v48 = vadd.f32 %v857_v4, %v191_v39  ;;  %v193_v49 = vmul.f32 %v852_v1, %v569_v40 }
  0x36   :  { %v322_v50 = vmax.f32 %v258_v42, 0.0  ;;  %v260_v51 = vadd.f32 %v857_v4, %v192_v43  ;;  %v573_v52 = vunpack.c.h.bf16 %v785_v32  ;;  %v194_v53 = vmul.f32 %v852_v1, %v572_v44  ;;  %v791_v32 = vld [vmem:[%s1176_s0 + $0xf0] sm:$0xff]  }
  0x37   :  { %812 = vst [vmem:[%s1179_s3 + $0xa0] sm:$0xff] %v705_v46   ;;  %v710_v55 = vpack.c.bf16 %v321_v47, %v320_v41  ;;  %v323_v56 = vmax.f32 %v259_v48, 0.0  ;;  %v261_v57 = vadd.f32 %v857_v4, %v193_v49  ;;  %v576_v58 = vunpack.c.l.bf16 %v786_v45  ;;  %v792_v41 = vld [vmem:[%s1176_s0 + $0xf8] sm:$0xff]  }
  0x38   :  { %v324_v59 = vmax.f32 %v260_v51, 0.0  ;;  %v195_v60 = vmul.f32 %v852_v1, %v573_v52  ;;  %v262_v61 = vadd.f32 %v857_v4, %v194_v53  ;;  %v577_v62 = vunpack.c.h.bf16 %v786_v45 }
  0x39   :  { %813 = vst [vmem:[%s1179_s3 + $0xa8] sm:$0xff] %v710_v55   ;;  %v715_v0 = vpack.c.bf16 %v323_v56, %v322_v50  ;;  %v325_v2 = vmax.f32 %v261_v57, 0.0  ;;  %v196_v3 = vmul.f32 %v852_v1, %v576_v58  ;;  %v580_v5 = vunpack.c.l.bf16 %v787_v54 }
  0x3a   :  { %v263_v6 = vadd.f32 %v857_v4, %v195_v60  ;;  %v326_v7 = vmax.f32 %v262_v61, 0.0  ;;  %v197_v8 = vmul.f32 %v852_v1, %v577_v62  ;;  %v581_v9 = vunpack.c.h.bf16 %v787_v54 }
  0x3b   :  { %814 = vst [vmem:[%s1179_s3 + $0xb0] sm:$0xff] %v715_v0   ;;  %v720_v11 = vpack.c.bf16 %v325_v2, %v324_v59  ;;  %v264_v12 = vadd.f32 %v857_v4, %v196_v3  ;;  %v198_v13 = vmul.f32 %v852_v1, %v580_v5  ;;  %v584_v14 = vunpack.c.l.bf16 %v788_v63 }
  0x3c   :  { %v327_v15 = vmax.f32 %v263_v6, 0.0  ;;  %v265_v16 = vadd.f32 %v857_v4, %v197_v8  ;;  %v199_v17 = vmul.f32 %v852_v1, %v581_v9  ;;  %v585_v18 = vunpack.c.h.bf16 %v788_v63 }
  0x3d   :  { %815 = vst [vmem:[%s1179_s3 + $0xb8] sm:$0xff] %v720_v11   ;;  %v328_v19 = vmax.f32 %v264_v12, 0.0  ;;  %v266_v20 = vadd.f32 %v857_v4, %v198_v13  ;;  %v200_v21 = vmul.f32 %v852_v1, %v584_v14  ;;  %v588_v22 = vunpack.c.l.bf16 %v789_v10 }
  0x3e   :  { %v725_v24 = vpack.c.bf16 %v327_v15, %v326_v7  ;;  %v329_v25 = vmax.f32 %v265_v16, 0.0  ;;  %v267_v26 = vadd.f32 %v857_v4, %v199_v17  ;;  %v201_v27 = vmul.f32 %v852_v1, %v585_v18 }
  0x3f   :  { %v330_v28 = vmax.f32 %v266_v20, 0.0  ;;  %v268_v29 = vadd.f32 %v857_v4, %v200_v21  ;;  %v589_v30 = vunpack.c.h.bf16 %v789_v10  ;;  %v202_v31 = vmul.f32 %v852_v1, %v588_v22 }
  0x40   :  { %816 = vst [vmem:[%s1179_s3 + $0xc0] sm:$0xff] %v725_v24   ;;  %v730_v33 = vpack.c.bf16 %v329_v25, %v328_v19  ;;  %v331_v34 = vmax.f32 %v267_v26, 0.0  ;;  %v269_v35 = vadd.f32 %v857_v4, %v201_v27  ;;  %v592_v36 = vunpack.c.l.bf16 %v790_v23 }
  0x41   :  { %v332_v37 = vmax.f32 %v268_v29, 0.0  ;;  %v203_v38 = vmul.f32 %v852_v1, %v589_v30  ;;  %v270_v39 = vadd.f32 %v857_v4, %v202_v31  ;;  %v593_v40 = vunpack.c.h.bf16 %v790_v23 }
  0x42   :  { %817 = vst [vmem:[%s1179_s3 + $0xc8] sm:$0xff] %v730_v33   ;;  %v735_v42 = vpack.c.bf16 %v331_v34, %v330_v28  ;;  %v333_v43 = vmax.f32 %v269_v35, 0.0  ;;  %v204_v44 = vmul.f32 %v852_v1, %v592_v36  ;;  %v596_v45 = vunpack.c.l.bf16 %v791_v32 }
  0x43   :  { %v271_v46 = vadd.f32 %v857_v4, %v203_v38  ;;  %v334_v47 = vmax.f32 %v270_v39, 0.0  ;;  %v205_v48 = vmul.f32 %v852_v1, %v593_v40  ;;  %v597_v49 = vunpack.c.h.bf16 %v791_v32 }
  0x44   :  { %818 = vst [vmem:[%s1179_s3 + $0xd0] sm:$0xff] %v735_v42   ;;  %v740_v50 = vpack.c.bf16 %v333_v43, %v332_v37  ;;  %v272_v51 = vadd.f32 %v857_v4, %v204_v44  ;;  %v206_v52 = vmul.f32 %v852_v1, %v596_v45  ;;  %v600_v53 = vunpack.c.l.bf16 %v792_v41 }
  0x45   :  { %v335_v54 = vmax.f32 %v271_v46, 0.0  ;;  %v273_v55 = vadd.f32 %v857_v4, %v205_v48  ;;  %v207_v56 = vmul.f32 %v852_v1, %v597_v49  ;;  %v601_v57 = vunpack.c.h.bf16 %v792_v41 }
  0x46   :  { %819 = vst [vmem:[%s1179_s3 + $0xd8] sm:$0xff] %v740_v50   ;;  %v336_v58 = vmax.f32 %v272_v51, 0.0  ;;  %v274_v59 = vadd.f32 %v857_v4, %v206_v52  ;;  %v208_v60 = vmul.f32 %v852_v1, %v600_v53 }
  0x47   :  { %v745_v61 = vpack.c.bf16 %v335_v54, %v334_v47  ;;  %v337_v62 = vmax.f32 %v273_v55, 0.0  ;;  %v275_v63 = vadd.f32 %v857_v4, %v207_v56  ;;  %v209_v0 = vmul.f32 %v852_v1, %v601_v57 }
  0x48   :  { %v338_v2 = vmax.f32 %v274_v59, 0.0  ;;  %v276_v3 = vadd.f32 %v857_v4, %v208_v60 }
  0x49   :  { %820 = vst [vmem:[%s1179_s3 + $0xe0] sm:$0xff] %v745_v61   ;;  %v750_v5 = vpack.c.bf16 %v337_v62, %v336_v58  ;;  %v339_v6 = vmax.f32 %v275_v63, 0.0  ;;  %v277_v7 = vadd.f32 %v857_v4, %v209_v0 }
  0x4a   :  { %v340_v8 = vmax.f32 %v276_v3, 0.0 }
  0x4b   :  { %821 = vst [vmem:[%s1179_s3 + $0xe8] sm:$0xff] %v750_v5   ;;  %v755_v9 = vpack.c.bf16 %v339_v6, %v338_v2  ;;  %v341_v10 = vmax.f32 %v277_v7, 0.0 }
  0x4d   :  { %822 = vst [vmem:[%s1179_s3 + $0xf0] sm:$0xff] %v755_v9   ;;  %v760_v1 = vpack.c.bf16 %v341_v10, %v340_v8 }
  0x4f   :  { %823 = vst [vmem:[%s1179_s3 + $0xf8] sm:$0xff] %v760_v1  }

// kernel: basic_block_forward.5
= control target key start
LH: loop header
LB: loop body
LE: loop exit
PB: predicated region body
PF: predicated region fallthrough
CT: control target
= control target key end

     0   :  { %s1787_s1 = inlined_call_operand.vmem [shape: bf16[128,128], index: 1, kind: input, shape index: {}]   ;;  %s1788_s0 = inlined_call_operand.vmem [shape: bf16[512,128], index: 0, kind: input, shape index: {}]   ;;  %s1789_s2 = inlined_call_operand.vmem [shape: bf16[512,128], index: 2, kind: output, shape index: {0}]   ;;  %s1790_s3 = inlined_call_operand.vmem [shape: f32[1,2,128], index: 3, kind: output, shape index: {1}]  }
   0x1   :  { %v1041_v0 = vld [vmem:[%s1787_s1 + $0x38] sm:$0xff]  ;;  %v1040_v1 = vld [vmem:[%s1787_s1 + $0x30] sm:$0xff]  ;;  %v1039_v2 = vld [vmem:[%s1787_s1 + $0x28] sm:$0xff] }
   0x2   :  { %333 = vmatpush.bf16.msra.mxu0 %v1041_v0  ;;  %1233 = vmatpush.bf16.msra.mxu1 %v1041_v0  ;;  %v1038_v3 = vld [vmem:[%s1787_s1 + $0x20] sm:$0xff]  ;;  %v1037_v4 = vld [vmem:[%s1787_s1 + $0x18] sm:$0xff]  ;;  %v1036_v5 = vld [vmem:[%s1787_s1 + $0x10] sm:$0xff] }
   0x3   :  { %1234 = vmatpush.bf16.msra.mxu2 %v1041_v0  ;;  %1235 = vmatpush.bf16.msra.mxu3 %v1041_v0  ;;  %v1035_v6 = vld [vmem:[%s1787_s1 + $0x8] sm:$0xff]  ;;  %v1034_v7 = vld [vmem:[%s1787_s1] sm:$0xff]  ;;  %v1004_v13 = vld [vmem:[%s1788_s0 + $0x10] sm:$0xff] }
   0x4   :  { %v1002_v8 = vld [vmem:[%s1788_s0] sm:$0xff]  ;;  %v1003_v10 = vld [vmem:[%s1788_s0 + $0x8] sm:$0xff]  ;;  %v1012_v14 = vld [vmem:[%s1788_s0 + $0x50] sm:$0xff] }
   0x5   :  { %v1010_v9 = vld [vmem:[%s1788_s0 + $0x40] sm:$0xff]  ;;  %v1011_v11 = vld [vmem:[%s1788_s0 + $0x48] sm:$0xff]  ;;  %v1005_v16 = vld [vmem:[%s1788_s0 + $0x18] sm:$0xff] }
   0x6   :  { %334 = vmatpush.bf16.msra.mxu0 %v1040_v1  ;;  %1236 = vmatpush.bf16.msra.mxu1 %v1040_v1  ;;  %v1018_v12 = vld [vmem:[%s1788_s0 + $0x80] sm:$0xff]  ;;  %v1019_v15 = vld [vmem:[%s1788_s0 + $0x88] sm:$0xff]  ;;  %v1013_v17 = vld [vmem:[%s1788_s0 + $0x58] sm:$0xff] }
   0x7   :  { %1237 = vmatpush.bf16.msra.mxu2 %v1040_v1  ;;  %1238 = vmatpush.bf16.msra.mxu3 %v1040_v1  ;;  %v1020_v18 = vld [vmem:[%s1788_s0 + $0x90] sm:$0xff]  ;;  %v1026_v19 = vld [vmem:[%s1788_s0 + $0xc0] sm:$0xff]  ;;  %v1021_v22 = vld [vmem:[%s1788_s0 + $0x98] sm:$0xff] }
   0x8   :  { %v1006_v20 = vld [vmem:[%s1788_s0 + $0x20] sm:$0xff]  ;;  %v1027_v23 = vld [vmem:[%s1788_s0 + $0xc8] sm:$0xff]  ;;  %v1028_v27 = vld [vmem:[%s1788_s0 + $0xd0] sm:$0xff] }
   0x9   :  { %v1014_v21 = vld [vmem:[%s1788_s0 + $0x60] sm:$0xff]  ;;  %v1007_v24 = vld [vmem:[%s1788_s0 + $0x28] sm:$0xff]  ;;  %v1008_v28 = vld [vmem:[%s1788_s0 + $0x30] sm:$0xff] }
   0xa   :  { %335 = vmatpush.bf16.msra.mxu0 %v1039_v2  ;;  %1239 = vmatpush.bf16.msra.mxu1 %v1039_v2  ;;  %v1015_v25 = vld [vmem:[%s1788_s0 + $0x68] sm:$0xff]  ;;  %v1022_v26 = vld [vmem:[%s1788_s0 + $0xa0] sm:$0xff]  ;;  %v1016_v29 = vld [vmem:[%s1788_s0 + $0x70] sm:$0xff] }
   0xb   :  { %1240 = vmatpush.bf16.msra.mxu2 %v1039_v2  ;;  %1241 = vmatpush.bf16.msra.mxu3 %v1039_v2  ;;  %v1023_v30 = vld [vmem:[%s1788_s0 + $0xa8] sm:$0xff]  ;;  %v1029_v31 = vld [vmem:[%s1788_s0 + $0xd8] sm:$0xff]  ;;  %v1024_v34 = vld [vmem:[%s1788_s0 + $0xb0] sm:$0xff] }
   0xc   :  { %v1009_v32 = vld [vmem:[%s1788_s0 + $0x38] sm:$0xff]  ;;  %v1030_v35 = vld [vmem:[%s1788_s0 + $0xe0] sm:$0xff]  ;;  %v1031_v39 = vld [vmem:[%s1788_s0 + $0xe8] sm:$0xff] }
   0xd   :  { %v1017_v33 = vld [vmem:[%s1788_s0 + $0x78] sm:$0xff]  ;;  %v1032_v53 = vld [vmem:[%s1788_s0 + $0xf0] sm:$0xff] }
   0xe   :  { %336 = vmatpush.bf16.msra.mxu0 %v1038_v3  ;;  %1242 = vmatpush.bf16.msra.mxu1 %v1038_v3  ;;  %v1025_v38 = vld [vmem:[%s1788_s0 + $0xb8] sm:$0xff] }
   0xf   :  { %1243 = vmatpush.bf16.msra.mxu2 %v1038_v3  ;;  %1244 = vmatpush.bf16.msra.mxu3 %v1038_v3 }
  0x12   :  { %337 = vmatpush.bf16.msra.mxu0 %v1037_v4  ;;  %1245 = vmatpush.bf16.msra.mxu1 %v1037_v4 }
  0x13   :  { %1246 = vmatpush.bf16.msra.mxu2 %v1037_v4  ;;  %1247 = vmatpush.bf16.msra.mxu3 %v1037_v4 }
  0x16   :  { %338 = vmatpush.bf16.msra.mxu0 %v1036_v5  ;;  %1248 = vmatpush.bf16.msra.mxu1 %v1036_v5 }
  0x17   :  { %1249 = vmatpush.bf16.msra.mxu2 %v1036_v5  ;;  %1250 = vmatpush.bf16.msra.mxu3 %v1036_v5  ;;  %v1033_v5 = vld [vmem:[%s1788_s0 + $0xf8] sm:$0xff] }
  0x1a   :  { %339 = vmatpush.bf16.msra.mxu0 %v1035_v6  ;;  %1251 = vmatpush.bf16.msra.mxu1 %v1035_v6 }
  0x1b   :  { %1252 = vmatpush.bf16.msra.mxu2 %v1035_v6  ;;  %1253 = vmatpush.bf16.msra.mxu3 %v1035_v6 }
  0x1e   :  { %340 = vmatpush.bf16.msra.mxu0 %v1034_v7  ;;  %1254 = vmatpush.bf16.msra.mxu1 %v1034_v7 }
  0x1f   :  { %1255 = vmatpush.bf16.msra.mxu2 %v1034_v7  ;;  %1256 = vmatpush.bf16.msra.mxu3 %v1034_v7 }
  0x21   :  { %341 = vmatmul.bf16.vlgmr.msra.gmra.mxu0 %v1002_v8  ;;  %381 = vmatmul.bf16.vlgmr.msra.gmra.mxu1 %v1010_v9 }
  0x22   :  { %421 = vmatmul.bf16.vlgmr.msra.gmra.mxu2 %v1018_v12  ;;  %461 = vmatmul.bf16.vlgmr.msra.gmra.mxu3 %v1026_v19 }
  0x31   :  { %346 = vmatmul.bf16.gmra.mxu0 %v1003_v10  ;;  %386 = vmatmul.bf16.gmra.mxu1 %v1011_v11 }
  0x32   :  { %426 = vmatmul.bf16.gmra.mxu2 %v1019_v15  ;;  %466 = vmatmul.bf16.gmra.mxu3 %v1027_v23 }
  0x41   :  { %351 = vmatmul.bf16.gmra.mxu0 %v1004_v13  ;;  %391 = vmatmul.bf16.gmra.mxu1 %v1012_v14 }
  0x42   :  { %431 = vmatmul.bf16.gmra.mxu2 %v1020_v18  ;;  %471 = vmatmul.bf16.gmra.mxu3 %v1028_v27 }
  0x51   :  { %356 = vmatmul.bf16.gmra.mxu0 %v1005_v16  ;;  %396 = vmatmul.bf16.gmra.mxu1 %v1013_v17 }
  0x52   :  { %436 = vmatmul.bf16.gmra.mxu2 %v1021_v22  ;;  %476 = vmatmul.bf16.gmra.mxu3 %v1029_v31 }
  0x61   :  { %361 = vmatmul.bf16.gmra.mxu0 %v1006_v20  ;;  %401 = vmatmul.bf16.gmra.mxu1 %v1014_v21 }
  0x62   :  { %441 = vmatmul.bf16.gmra.mxu2 %v1022_v26  ;;  %481 = vmatmul.bf16.gmra.mxu3 %v1030_v35 }
  0x71   :  { %366 = vmatmul.bf16.gmra.mxu0 %v1007_v24  ;;  %406 = vmatmul.bf16.gmra.mxu1 %v1015_v25 }
  0x72   :  { %446 = vmatmul.bf16.gmra.mxu2 %v1023_v30  ;;  %486 = vmatmul.bf16.gmra.mxu3 %v1031_v39 }
  0x81   :  { %371 = vmatmul.bf16.gmra.mxu0 %v1008_v28  ;;  %411 = vmatmul.bf16.gmra.mxu1 %v1016_v29 }
  0x82   :  { %451 = vmatmul.bf16.gmra.mxu2 %v1024_v34  ;;  %491 = vmatmul.bf16.gmra.mxu3 %v1032_v53 }
  0x91   :  { %376 = vmatmul.bf16.gmra.mxu0 %v1009_v32  ;;  %416 = vmatmul.bf16.gmra.mxu1 %v1017_v33 }
  0x92   :  { %456 = vmatmul.bf16.gmra.mxu2 %v1025_v38  ;;  %496 = vmatmul.bf16.gmra.mxu3 %v1033_v5 }
  0x9e   :  { %v342_v36 = vpop.f32.mrf.mxu0  ;;  %v1385_v37 = vpop.f32.mrf.mxu1 }
  0x9f   :  { %v700_v40 = vmul.f32 %v342_v36, %v342_v36 }
  0xa5   :  { %v1412_v60 = vpop.f32.mrf.mxu2  ;;  %v1463_v20 = vpop.f32.mrf.mxu3 }
  0xa6   :  { %v344_v41 = vpop.f32.mrf.mxu0  ;;  %v1393_v42 = vpop.f32.mrf.mxu1 }
  0xa7   :  { %v1045_v43 = vpack.c.bf16 %v344_v41, %v342_v36  ;;  %v630_v44 = vadd.f32 %v344_v41, %v342_v36  ;;  %v701_v45 = vmul.f32 %v344_v41, %v344_v41  ;;  %v1085_v46 = vpack.c.bf16 %v1393_v42, %v1385_v37 }
  0xa9   :  { %1046 = vst [vmem:[%s1789_s2] sm:$0xff] %v1045_v43   ;;  %v764_v47 = vadd.f32 %v701_v45, %v700_v40 }
  0xaa   :  { %1209 = vst [vmem:[%s1789_s2 + $0x40] sm:$0xff] %v1085_v46  }
  0xad   :  { %v1424_v2 = vpop.f32.mrf.mxu2  ;;  %v1475_v24 = vpop.f32.mrf.mxu3 }
  0xae   :  { %v347_v48 = vpop.f32.mrf.mxu0  ;;  %v1403_v49 = vpop.f32.mrf.mxu1  ;;  %v1125_v3 = vpack.c.bf16 %v1424_v2, %v1412_v60  ;;  %v1165_v26 = vpack.c.bf16 %v1475_v24, %v1463_v20 }
  0xaf   :  { %v631_v50 = vadd.f32 %v630_v44, %v347_v48  ;;  %v702_v51 = vmul.f32 %v347_v48, %v347_v48 }
  0xb0   :  { %1217 = vst [vmem:[%s1789_s2 + $0x80] sm:$0xff] %v1125_v3  }
  0xb1   :  { %v765_v52 = vadd.f32 %v764_v47, %v702_v51  ;;  %1225 = vst [vmem:[%s1789_s2 + $0xc0] sm:$0xff] %v1165_v26  }
  0xb5   :  { %v1440_v10 = vpop.f32.mrf.mxu2  ;;  %v1493_v32 = vpop.f32.mrf.mxu3 }
  0xb6   :  { %v349_v54 = vpop.f32.mrf.mxu0  ;;  %v1408_v55 = vpop.f32.mrf.mxu1 }
  0xb7   :  { %v1050_v56 = vpack.c.bf16 %v349_v54, %v347_v48  ;;  %v632_v57 = vadd.f32 %v631_v50, %v349_v54  ;;  %v703_v58 = vmul.f32 %v349_v54, %v349_v54  ;;  %v1090_v59 = vpack.c.bf16 %v1408_v55, %v1403_v49 }
  0xb9   :  { %1202 = vst [vmem:[%s1789_s2 + $0x8] sm:$0xff] %v1050_v56   ;;  %v766_v61 = vadd.f32 %v765_v52, %v703_v58 }
  0xba   :  { %1210 = vst [vmem:[%s1789_s2 + $0x48] sm:$0xff] %v1090_v59  }
  0xbd   :  { %v1450_v13 = vpop.f32.mrf.mxu2  ;;  %v1505_v36 = vpop.f32.mrf.mxu3 }
  0xbe   :  { %v352_v62 = vpop.f32.mrf.mxu0  ;;  %v1420_v63 = vpop.f32.mrf.mxu1  ;;  %v1130_v14 = vpack.c.bf16 %v1450_v13, %v1440_v10  ;;  %v1170_v39 = vpack.c.bf16 %v1505_v36, %v1493_v32 }
  0xbf   :  { %v1422_v0 = vadd.f32 %v632_v57, %v352_v62  ;;  %v704_v1 = vmul.f32 %v352_v62, %v352_v62 }
  0xc0   :  { %1218 = vst [vmem:[%s1789_s2 + $0x88] sm:$0xff] %v1130_v14  }
  0xc1   :  { %v1428_v4 = vadd.f32 %v766_v61, %v704_v1  ;;  %1226 = vst [vmem:[%s1789_s2 + $0xc8] sm:$0xff] %v1170_v39  }
  0xc5   :  { %v1461_v19 = vpop.f32.mrf.mxu2  ;;  %v1523_v46 = vpop.f32.mrf.mxu3 }
  0xc6   :  { %v354_v6 = vpop.f32.mrf.mxu0  ;;  %v1436_v7 = vpop.f32.mrf.mxu1 }
  0xc7   :  { %v1055_v8 = vpack.c.bf16 %v354_v6, %v352_v62  ;;  %v1095_v9 = vpack.c.bf16 %v1436_v7, %v1420_v63  ;;  %v705_v52 = vmul.f32 %v354_v6, %v354_v6  ;;  %v634_v57 = vadd.f32 %v1422_v0, %v354_v6 }
  0xc9   :  { %1203 = vst [vmem:[%s1789_s2 + $0x10] sm:$0xff] %v1055_v8   ;;  %v768_v58 = vadd.f32 %v1428_v4, %v705_v52 }
  0xca   :  { %1211 = vst [vmem:[%s1789_s2 + $0x50] sm:$0xff] %v1095_v9  }
  0xcd   :  { %v1473_v23 = vpop.f32.mrf.mxu2  ;;  %v1535_v51 = vpop.f32.mrf.mxu3 }
  0xce   :  { %v357_v11 = vpop.f32.mrf.mxu0  ;;  %v1448_v12 = vpop.f32.mrf.mxu1  ;;  %v1135_v25 = vpack.c.bf16 %v1473_v23, %v1461_v19  ;;  %v1175_v54 = vpack.c.bf16 %v1535_v51, %v1523_v46 }
  0xcf   :  { %v706_v56 = vmul.f32 %v357_v11, %v357_v11  ;;  %v635_v61 = vadd.f32 %v634_v57, %v357_v11 }
  0xd0   :  { %1219 = vst [vmem:[%s1789_s2 + $0x90] sm:$0xff] %v1135_v25  }
  0xd1   :  { %1227 = vst [vmem:[%s1789_s2 + $0xd0] sm:$0xff] %v1175_v54   ;;  %v769_v62 = vadd.f32 %v768_v58, %v706_v56 }
  0xd5   :  { %v1491_v31 = vpop.f32.mrf.mxu2  ;;  %v1555_v0 = vpop.f32.mrf.mxu3 }
  0xd6   :  { %v359_v15 = vpop.f32.mrf.mxu0  ;;  %v1457_v16 = vpop.f32.mrf.mxu1 }
  0xd7   :  { %v1060_v17 = vpack.c.bf16 %v359_v15, %v357_v11  ;;  %v1100_v18 = vpack.c.bf16 %v1457_v16, %v1448_v12  ;;  %v707_v59 = vmul.f32 %v359_v15, %v359_v15  ;;  %v636_v8 = vadd.f32 %v635_v61, %v359_v15 }
  0xd9   :  { %1204 = vst [vmem:[%s1789_s2 + $0x18] sm:$0xff] %v1060_v17   ;;  %v770_v6 = vadd.f32 %v769_v62, %v707_v59 }
  0xda   :  { %1212 = vst [vmem:[%s1789_s2 + $0x58] sm:$0xff] %v1100_v18  }
  0xdd   :  { %v1503_v35 = vpop.f32.mrf.mxu2 }
  0xde   :  { %v362_v21 = vpop.f32.mrf.mxu0  ;;  %v1471_v22 = vpop.f32.mrf.mxu1  ;;  %v1140_v38 = vpack.c.bf16 %v1503_v35, %v1491_v31 }
  0xdf   :  { %v708_v1 = vmul.f32 %v362_v21, %v362_v21  ;;  %v637_v25 = vadd.f32 %v636_v8, %v362_v21 }
  0xe0   :  { %1220 = vst [vmem:[%s1789_s2 + $0x98] sm:$0xff] %v1140_v38  }
  0xe1   :  { %v771_v4 = vadd.f32 %v770_v6, %v708_v1 }
  0xe5   :  { %v1521_v45 = vpop.f32.mrf.mxu2 }
  0xe6   :  { %v364_v27 = vpop.f32.mrf.mxu0  ;;  %v1487_v28 = vpop.f32.mrf.mxu1 }
  0xe7   :  { %v1065_v29 = vpack.c.bf16 %v364_v27, %v362_v21  ;;  %v1105_v30 = vpack.c.bf16 %v1487_v28, %v1471_v22  ;;  %v709_v18 = vmul.f32 %v364_v27, %v364_v27  ;;  %v638_v15 = vadd.f32 %v637_v25, %v364_v27 }
  0xe9   :  { %1205 = vst [vmem:[%s1789_s2 + $0x20] sm:$0xff] %v1065_v29   ;;  %v772_v26 = vadd.f32 %v771_v4, %v709_v18 }
  0xea   :  { %1213 = vst [vmem:[%s1789_s2 + $0x60] sm:$0xff] %v1105_v30  }
  0xed   :  { %v1533_v50 = vpop.f32.mrf.mxu2 }
  0xee   :  { %v367_v33 = vpop.f32.mrf.mxu0  ;;  %v1501_v34 = vpop.f32.mrf.mxu1  ;;  %v1145_v53 = vpack.c.bf16 %v1533_v50, %v1521_v45 }
  0xef   :  { %v710_v11 = vmul.f32 %v367_v33, %v367_v33  ;;  %v639_v30 = vadd.f32 %v638_v15, %v367_v33 }
  0xf0   :  { %1221 = vst [vmem:[%s1789_s2 + $0xa0] sm:$0xff] %v1145_v53   ;;  %v1567_v53 = vpop.f32.mrf.mxu3 }
  0xf1   :  { %v773_v38 = vadd.f32 %v772_v26, %v710_v11  ;;  %v1180_v27 = vpack.c.bf16 %v1567_v53, %v1555_v0  ;;  %v717_v26 = vmul.f32 %v1393_v42, %v1393_v42 }
  0xf3   :  { %1228 = vst [vmem:[%s1789_s2 + $0xd8] sm:$0xff] %v1180_v27  }
  0xf5   :  { %v1553_v17 = vpop.f32.mrf.mxu2 }
  0xf6   :  { %v369_v40 = vpop.f32.mrf.mxu0  ;;  %v1517_v41 = vpop.f32.mrf.mxu1 }
  0xf7   :  { %v1070_v43 = vpack.c.bf16 %v369_v40, %v367_v33  ;;  %v1110_v44 = vpack.c.bf16 %v1517_v41, %v1501_v34  ;;  %v711_v29 = vmul.f32 %v369_v40, %v369_v40  ;;  %v640_v21 = vadd.f32 %v639_v30, %v369_v40 }
  0xf8   :  { %v1585_v4 = vpop.f32.mrf.mxu3 }
  0xf9   :  { %1206 = vst [vmem:[%s1789_s2 + $0x28] sm:$0xff] %v1070_v43   ;;  %v774_v54 = vadd.f32 %v773_v38, %v711_v29  ;;  %v718_v38 = vmul.f32 %v1403_v49, %v1403_v49 }
  0xfa   :  { %1214 = vst [vmem:[%s1789_s2 + $0x68] sm:$0xff] %v1110_v44  }
  0xfd   :  { %v1565_v52 = vpop.f32.mrf.mxu2 }
  0xfe   :  { %v372_v47 = vpop.f32.mrf.mxu0  ;;  %v1531_v48 = vpop.f32.mrf.mxu1  ;;  %v1150_v57 = vpack.c.bf16 %v1565_v52, %v1553_v17 }
  0xff   :  { %v712_v39 = vmul.f32 %v372_v47, %v372_v47  ;;  %v641_v58 = vadd.f32 %v640_v21, %v372_v47 }
 0x100   :  { %1222 = vst [vmem:[%s1789_s2 + $0xa8] sm:$0xff] %v1150_v57   ;;  %v1607_v57 = vpop.f32.mrf.mxu3 }
 0x101   :  { %v775_v33 = vadd.f32 %v774_v54, %v712_v39  ;;  %v1185_v27 = vpack.c.bf16 %v1607_v57, %v1585_v4 }
 0x103   :  { %1229 = vst [vmem:[%s1789_s2 + $0xe0] sm:$0xff] %v1185_v27  }
 0x105   :  { %v1583_v25 = vpop.f32.mrf.mxu2 }
 0x106   :  { %v374_v3 = vpop.f32.mrf.mxu0  ;;  %v1549_v5 = vpop.f32.mrf.mxu1 }
 0x107   :  { %v1075_v9 = vpack.c.bf16 %v374_v3, %v372_v47  ;;  %v1115_v14 = vpack.c.bf16 %v1549_v5, %v1531_v48  ;;  %v713_v56 = vmul.f32 %v374_v3, %v374_v3  ;;  %v642_v40 = vadd.f32 %v641_v58, %v374_v3 }
 0x108   :  { %v716_v3 = vmul.f32 %v1385_v37, %v1385_v37  ;;  %v729_v27 = vmul.f32 %v1549_v5, %v1549_v5 }
 0x109   :  { %1207 = vst [vmem:[%s1789_s2 + $0x30] sm:$0xff] %v1075_v9   ;;  %v776_v61 = vadd.f32 %v775_v33, %v713_v56 }
 0x10a   :  { %1215 = vst [vmem:[%s1789_s2 + $0x70] sm:$0xff] %v1115_v14  }
 0x10d   :  { %v1605_v56 = vpop.f32.mrf.mxu2 }
 0x10e   :  { %v377_v43 = vpop.f32.mrf.mxu0  ;;  %v1563_v44 = vpop.f32.mrf.mxu1 }
 0x10f   :  { %v714_v59 = vmul.f32 %v377_v43, %v377_v43  ;;  %v643_v62 = vadd.f32 %v642_v40, %v377_v43 }
 0x111   :  { %v777_v1 = vadd.f32 %v776_v61, %v714_v59  ;;  %v722_v61 = vmul.f32 %v1448_v12, %v1448_v12 }
 0x116   :  { %v379_v8 = vpop.f32.mrf.mxu0  ;;  %v1579_v9 = vpop.f32.mrf.mxu1 }
 0x117   :  { %v1080_v14 = vpack.c.bf16 %v379_v8, %v377_v43  ;;  %v644_v6 = vadd.f32 %v643_v62, %v379_v8  ;;  %v715_v47 = vmul.f32 %v379_v8, %v379_v8  ;;  %v1120_v18 = vpack.c.bf16 %v1579_v9, %v1563_v44 }
 0x119   :  { %1208 = vst [vmem:[%s1789_s2 + $0x38] sm:$0xff] %v1080_v14   ;;  %v645_v11 = vadd.f32 %v644_v6, %v1385_v37  ;;  %v778_v15 = vadd.f32 %v777_v1, %v715_v47  ;;  %v719_v37 = vmul.f32 %v1408_v55, %v1408_v55  ;;  %v723_v1 = vmul.f32 %v1457_v16, %v1457_v16  ;;  %v1631_v6 = vpop.f32.mrf.mxu2 }
 0x11a   :  { %1216 = vst [vmem:[%s1789_s2 + $0x78] sm:$0xff] %v1120_v18   ;;  %v724_v47 = vmul.f32 %v1471_v22, %v1471_v22 }
 0x11b   :  { %v646_v29 = vadd.f32 %v645_v11, %v1393_v42  ;;  %v779_v30 = vadd.f32 %v778_v15, %v716_v3  ;;  %v1155_v42 = vpack.c.bf16 %v1605_v56, %v1583_v25  ;;  %v725_v11 = vmul.f32 %v1487_v28, %v1487_v28 }
 0x11d   :  { %v647_v39 = vadd.f32 %v646_v29, %v1403_v49  ;;  %v780_v43 = vadd.f32 %v779_v30, %v717_v26  ;;  %v720_v49 = vmul.f32 %v1420_v63, %v1420_v63  ;;  %1223 = vst [vmem:[%s1789_s2 + $0xb0] sm:$0xff] %v1155_v42   ;;  %v727_v30 = vmul.f32 %v1517_v41, %v1517_v41 }
 0x11f   :  { %v648_v21 = vadd.f32 %v647_v39, %v1408_v55  ;;  %v781_v54 = vadd.f32 %v780_v43, %v718_v38  ;;  %v721_v55 = vmul.f32 %v1436_v7, %v1436_v7 }
 0x121   :  { %v649_v58 = vadd.f32 %v648_v21, %v1420_v63  ;;  %v782_v33 = vadd.f32 %v781_v54, %v719_v37 }
 0x123   :  { %v650_v59 = vadd.f32 %v649_v58, %v1436_v7  ;;  %v783_v40 = vadd.f32 %v782_v33, %v720_v49  ;;  %v1633_v7 = vpop.f32.mrf.mxu3 }
 0x125   :  { %v784_v62 = vadd.f32 %v783_v40, %v721_v55  ;;  %v651_v63 = vadd.f32 %v650_v59, %v1448_v12  ;;  %v731_v59 = vmul.f32 %v1579_v9, %v1579_v9 }
 0x127   :  { %v652_v8 = vadd.f32 %v651_v63, %v1457_v16  ;;  %v785_v14 = vadd.f32 %v784_v62, %v722_v61  ;;  %v726_v16 = vmul.f32 %v1501_v34, %v1501_v34  ;;  %v733_v63 = vmul.f32 %v1424_v2, %v1424_v2 }
 0x129   :  { %v653_v18 = vadd.f32 %v652_v8, %v1471_v22  ;;  %v786_v3 = vadd.f32 %v785_v14, %v723_v1  ;;  %v1647_v22 = vpop.f32.mrf.mxu2  ;;  %v734_v8 = vmul.f32 %v1440_v10, %v1440_v10 }
 0x12b   :  { %v654_v12 = vadd.f32 %v653_v18, %v1487_v28  ;;  %v787_v15 = vadd.f32 %v786_v3, %v724_v47  ;;  %v1649_v43 = vpop.f32.mrf.mxu3  ;;  %v1160_v28 = vpack.c.bf16 %v1647_v22, %v1631_v6  ;;  %v735_v47 = vmul.f32 %v1450_v13, %v1450_v13 }
 0x12c   :  { %v1190_v37 = vpack.c.bf16 %v1649_v43, %v1633_v7 }
 0x12d   :  { %v655_v26 = vadd.f32 %v654_v12, %v1501_v34  ;;  %v788_v29 = vadd.f32 %v787_v15, %v725_v11  ;;  %v728_v34 = vmul.f32 %v1531_v48, %v1531_v48  ;;  %1224 = vst [vmem:[%s1789_s2 + $0xb8] sm:$0xff] %v1160_v28  }
 0x12e   :  { %1230 = vst [vmem:[%s1789_s2 + $0xe8] sm:$0xff] %v1190_v37   ;;  %v740_v37 = vmul.f32 %v1521_v45, %v1521_v45 }
 0x12f   :  { %v656_v38 = vadd.f32 %v655_v26, %v1517_v41  ;;  %v789_v39 = vadd.f32 %v788_v29, %v726_v16  ;;  %v738_v26 = vmul.f32 %v1491_v31, %v1491_v31 }
 0x131   :  { %v657_v21 = vadd.f32 %v656_v38, %v1531_v48  ;;  %v790_v54 = vadd.f32 %v789_v39, %v727_v30  ;;  %v730_v48 = vmul.f32 %v1563_v44, %v1563_v44 }
 0x133   :  { %v791_v41 = vadd.f32 %v790_v54, %v728_v34  ;;  %v658_v42 = vadd.f32 %v657_v21, %v1549_v5  ;;  %v1673_v40 = vpop.f32.mrf.mxu3  ;;  %v732_v5 = vmul.f32 %v1412_v60, %v1412_v60  ;;  %v741_v34 = vmul.f32 %v1533_v50, %v1533_v50 }
 0x135   :  { %v792_v49 = vadd.f32 %v791_v41, %v729_v27  ;;  %v659_v58 = vadd.f32 %v658_v42, %v1563_v44  ;;  %v742_v41 = vmul.f32 %v1553_v17, %v1553_v17 }
 0x137   :  { %v793_v33 = vadd.f32 %v792_v49, %v730_v48  ;;  %v660_v55 = vadd.f32 %v659_v58, %v1579_v9  ;;  %v743_v49 = vmul.f32 %v1565_v52, %v1565_v52 }
 0x139   :  { %v661_v61 = vadd.f32 %v660_v55, %v1412_v60  ;;  %v794_v62 = vadd.f32 %v793_v33, %v731_v59 }
 0x13b   :  { %v662_v1 = vadd.f32 %v661_v61, %v1424_v2  ;;  %v795_v44 = vadd.f32 %v794_v62, %v732_v5  ;;  %v1687_v60 = vpop.f32.mrf.mxu3  ;;  %v736_v2 = vmul.f32 %v1461_v19, %v1461_v19  ;;  %v746_v62 = vmul.f32 %v1631_v6, %v1631_v6 }
 0x13c   :  { %v1195_v11 = vpack.c.bf16 %v1687_v60, %v1673_v40 }
 0x13d   :  { %v663_v14 = vadd.f32 %v662_v1, %v1440_v10  ;;  %v796_v9 = vadd.f32 %v795_v44, %v733_v63  ;;  %v737_v10 = vmul.f32 %v1473_v23, %v1473_v23  ;;  %v748_v44 = vmul.f32 %v1463_v20, %v1463_v20 }
 0x13e   :  { %1231 = vst [vmem:[%s1789_s2 + $0xf0] sm:$0xff] %v1195_v11  }
 0x13f   :  { %v664_v18 = vadd.f32 %v663_v14, %v1450_v13  ;;  %v797_v3 = vadd.f32 %v796_v9, %v734_v8 }
 0x141   :  { %v665_v12 = vadd.f32 %v664_v18, %v1461_v19  ;;  %v798_v15 = vadd.f32 %v797_v3, %v735_v47  ;;  %v739_v19 = vmul.f32 %v1503_v35, %v1503_v35 }
 0x143   :  { %v666_v13 = vadd.f32 %v665_v12, %v1473_v23  ;;  %v799_v16 = vadd.f32 %v798_v15, %v736_v2  ;;  %v1706_v28 = vpop.f32.mrf.mxu3 }
 0x145   :  { %v800_v29 = vadd.f32 %v799_v16, %v737_v10  ;;  %v667_v30 = vadd.f32 %v666_v13, %v1491_v31 }
 0x147   :  { %v668_v38 = vadd.f32 %v667_v30, %v1503_v35  ;;  %v801_v39 = vadd.f32 %v800_v29, %v738_v26 }
 0x149   :  { %v669_v23 = vadd.f32 %v668_v38, %v1521_v45  ;;  %v802_v21 = vadd.f32 %v801_v39, %v739_v19 }
 0x14b   :  { %v670_v54 = vadd.f32 %v669_v23, %v1533_v50  ;;  %v803_v31 = vadd.f32 %v802_v21, %v740_v37  ;;  %v499_v45 = vpop.f32.mrf.mxu3  ;;  %v744_v50 = vmul.f32 %v1583_v25, %v1583_v25 }
 0x14c   :  { %v1200_v48 = vpack.c.bf16 %v499_v45, %v1706_v28 }
 0x14d   :  { %v671_v35 = vadd.f32 %v670_v54, %v1553_v17  ;;  %v804_v42 = vadd.f32 %v803_v31, %v741_v34  ;;  %v759_v34 = vmul.f32 %v1649_v43, %v1649_v43 }
 0x14e   :  { %1232 = vst [vmem:[%s1789_s2 + $0xf8] sm:$0xff] %v1200_v48   ;;  %v763_v48 = vmul.f32 %v499_v45, %v499_v45 }
 0x14f   :  { %v672_v27 = vadd.f32 %v671_v35, %v1565_v52  ;;  %v805_v58 = vadd.f32 %v804_v42, %v742_v41  ;;  %v745_v52 = vmul.f32 %v1605_v56, %v1605_v56  ;;  %v760_v41 = vmul.f32 %v1673_v40, %v1673_v40 }
 0x150   :  { %v761_v42 = vmul.f32 %v1687_v60, %v1687_v60 }
 0x151   :  { %v806_v33 = vadd.f32 %v805_v58, %v743_v49  ;;  %v673_v55 = vadd.f32 %v672_v27, %v1583_v25  ;;  %v747_v25 = vmul.f32 %v1647_v22, %v1647_v22  ;;  %v762_v49 = vmul.f32 %v1706_v28, %v1706_v28 }
 0x153   :  { %v807_v17 = vadd.f32 %v806_v33, %v744_v50  ;;  %v674_v59 = vadd.f32 %v673_v55, %v1605_v56  ;;  %v749_v56 = vmul.f32 %v1475_v24, %v1475_v24 }
 0x155   :  { %v808_v5 = vadd.f32 %v807_v17, %v745_v52  ;;  %v675_v61 = vadd.f32 %v674_v59, %v1631_v6  ;;  %v750_v6 = vmul.f32 %v1493_v32, %v1493_v32 }
 0x157   :  { %v809_v63 = vadd.f32 %v808_v5, %v746_v62  ;;  %v676_v1 = vadd.f32 %v675_v61, %v1647_v22  ;;  %v751_v22 = vmul.f32 %v1505_v36, %v1505_v36 }
 0x159   :  { %v677_v8 = vadd.f32 %v676_v1, %v1463_v20  ;;  %v810_v14 = vadd.f32 %v809_v63, %v747_v25  ;;  %v752_v20 = vmul.f32 %v1523_v46, %v1523_v46 }
 0x15b   :  { %v678_v9 = vadd.f32 %v677_v8, %v1475_v24  ;;  %v811_v47 = vadd.f32 %v810_v14, %v748_v44  ;;  %v753_v24 = vmul.f32 %v1535_v51, %v1535_v51 }
 0x15d   :  { %v679_v18 = vadd.f32 %v678_v9, %v1493_v32  ;;  %v812_v3 = vadd.f32 %v811_v47, %v749_v56  ;;  %v754_v32 = vmul.f32 %v1555_v0, %v1555_v0 }
 0x15f   :  { %v680_v11 = vadd.f32 %v679_v18, %v1505_v36  ;;  %v813_v2 = vadd.f32 %v812_v3, %v750_v6  ;;  %v755_v36 = vmul.f32 %v1567_v53, %v1567_v53 }
 0x161   :  { %v681_v12 = vadd.f32 %v680_v11, %v1523_v46  ;;  %v814_v15 = vadd.f32 %v813_v2, %v751_v22  ;;  %v756_v46 = vmul.f32 %v1585_v4, %v1585_v4 }
 0x163   :  { %v682_v10 = vadd.f32 %v681_v12, %v1535_v51  ;;  %v815_v13 = vadd.f32 %v814_v15, %v752_v20  ;;  %v757_v51 = vmul.f32 %v1607_v57, %v1607_v57 }
 0x165   :  { %v816_v16 = vadd.f32 %v815_v13, %v753_v24  ;;  %v683_v26 = vadd.f32 %v682_v10, %v1555_v0  ;;  %v758_v0 = vmul.f32 %v1633_v7, %v1633_v7 }
 0x167   :  { %v684_v29 = vadd.f32 %v683_v26, %v1567_v53  ;;  %v817_v30 = vadd.f32 %v816_v16, %v754_v32 }
 0x169   :  { %v685_v19 = vadd.f32 %v684_v29, %v1585_v4  ;;  %v818_v38 = vadd.f32 %v817_v30, %v755_v36 }
 0x16b   :  { %v686_v39 = vadd.f32 %v685_v19, %v1607_v57  ;;  %v819_v37 = vadd.f32 %v818_v38, %v756_v46 }
 0x16d   :  { %v687_v23 = vadd.f32 %v686_v39, %v1633_v7  ;;  %v820_v21 = vadd.f32 %v819_v37, %v757_v51 }
 0x16f   :  { %v688_v53 = vadd.f32 %v687_v23, %v1649_v43  ;;  %v821_v54 = vadd.f32 %v820_v21, %v758_v0 }
 0x171   :  { %v822_v4 = vadd.f32 %v821_v54, %v759_v34  ;;  %v689_v31 = vadd.f32 %v688_v53, %v1673_v40 }
 0x173   :  { %v823_v57 = vadd.f32 %v822_v4, %v760_v41  ;;  %v690_v35 = vadd.f32 %v689_v31, %v1687_v60 }
 0x175   :  { %v824_v7 = vadd.f32 %v823_v57, %v761_v42  ;;  %v691_v27 = vadd.f32 %v690_v35, %v1706_v28 }
 0x177   :  { %v825_v43 = vadd.f32 %v824_v7, %v762_v49  ;;  %v692_v58 = vadd.f32 %v691_v27, %v499_v45 }
 0x179   :  { %v693_v33 = vrot.slane %v692_v58, 4  ;;  %v826_v55 = vadd.f32 %v825_v43, %v763_v48 }
 0x17b   :  { %v694_v50 = vadd.f32 %v693_v33, %v692_v58  ;;  %v827_v17 = vrot.slane %v826_v55, 4 }
 0x17d   :  { %v695_v40 = vrot.slane %v694_v50, 2  ;;  %v828_v59 = vadd.f32 %v827_v17, %v826_v55 }
 0x17f   :  { %v696_v52 = vadd.f32 %v695_v40, %v694_v50  ;;  %v829_v5 = vrot.slane %v828_v59, 2 }
 0x181   :  { %v697_v61 = vrot.slane %v696_v52, 1  ;;  %v830_v62 = vadd.f32 %v829_v5, %v828_v59 }
 0x183   :  { %v698_v60 = vadd.f32 %v697_v61, %v696_v52  ;;  %v831_v63 = vrot.slane %v830_v62, 1 }
 0x185   :  { %699 = vst [vmem:[%s1790_s3] sm:$0x1] %v698_v60  ;;  %v832_v28 = vadd.f32 %v831_v63, %v830_v62 }
 0x187   :  { %833 = vst [vmem:[%s1790_s3 + $0x1] sm:$0x1] %v832_v28 }

// kernel: basic_block_forward.9
= control target key start
LH: loop header
LB: loop body
LE: loop exit
PB: predicated region body
PF: predicated region fallthrough
CT: control target
= control target key end

     0   :  { %s1788_s0 = inlined_call_operand.vmem [shape: bf16[512,128], index: 0, kind: input, shape index: {}]   ;;  %s1789_s1 = inlined_call_operand.vmem [shape: f32[1,128], index: 1, kind: input, shape index: {}]   ;;  %s1790_s2 = inlined_call_operand.vmem [shape: f32[1,128], index: 2, kind: input, shape index: {}]   ;;  %s1791_s3 = inlined_call_operand.vmem [shape: bf16[512,128], index: 3, kind: input, shape index: {}]   ;;  %s1792_s4 = inlined_call_operand.vmem [shape: f32[1,128], index: 4, kind: input, shape index: {}]   ;;  %s1793_s5 = inlined_call_operand.vmem [shape: f32[1,128], index: 5, kind: input, shape index: {}]   ;;  %s1794_s6 = inlined_call_operand.vmem [shape: f32[512,128], index: 6, kind: output, shape index: {}]  }
   0x1   :  { %v748_v0 = vld [vmem:[%s1788_s0] sm:$0xff]   ;;  %v1003_v12 = vld [vmem:[%s1788_s0 + $0x8] sm:$0xff]   ;;  %v1004_v18 = vld [vmem:[%s1788_s0 + $0x10] sm:$0xff]  }
   0x2   :  { %v1114_v1 = vld [vmem:[%s1789_s1] ss:$0 sm:$0xff]  ;;  %v749_v2 = vunpack.c.l.bf16 %v748_v0  ;;  %v750_v5 = vunpack.c.h.bf16 %v748_v0  ;;  %v1034_v13 = vld [vmem:[%s1791_s3 + $0x8] sm:$0xff]   ;;  %v753_v16 = vunpack.c.l.bf16 %v1003_v12  ;;  %v1035_v19 = vld [vmem:[%s1791_s3 + $0x10] sm:$0xff]   ;;  %v754_v22 = vunpack.c.h.bf16 %v1003_v12 }
   0x3   :  { %v1119_v3 = vld [vmem:[%s1790_s2] ss:$0 sm:$0xff]  ;;  %v881_v17 = vunpack.c.l.bf16 %v1034_v13  ;;  %v882_v23 = vunpack.c.h.bf16 %v1034_v13  ;;  %v757_v30 = vunpack.c.l.bf16 %v1004_v18  ;;  %v885_v31 = vunpack.c.l.bf16 %v1035_v19  ;;  %v1005_v40 = vld [vmem:[%s1788_s0 + $0x18] sm:$0xff]   ;;  %v1007_v12 = vld [vmem:[%s1788_s0 + $0x28] sm:$0xff]  }
   0x4   :  { %v876_v4 = vld [vmem:[%s1791_s3] sm:$0xff]   ;;  %v155_v9 = vmul.f32 %v1114_v1, %v749_v2  ;;  %v156_v11 = vmul.f32 %v1114_v1, %v750_v5  ;;  %v157_v26 = vmul.f32 %v1114_v1, %v753_v16  ;;  %v158_v28 = vmul.f32 %v1114_v1, %v754_v22  ;;  %v1036_v41 = vld [vmem:[%s1791_s3 + $0x18] sm:$0xff]  }
   0x5   :  { %v877_v6 = vunpack.c.l.bf16 %v876_v4  ;;  %v1127_v7 = vld [vmem:[%s1792_s4] ss:$0 sm:$0xff]  ;;  %v878_v8 = vunpack.c.h.bf16 %v876_v4  ;;  %v159_v38 = vmul.f32 %v1114_v1, %v757_v30  ;;  %v758_v45 = vunpack.c.h.bf16 %v1004_v18  ;;  %v1008_v30 = vld [vmem:[%s1788_s0 + $0x30] sm:$0xff]  }
   0x6   :  { %v1133_v10 = vld [vmem:[%s1793_s5] ss:$0 sm:$0xff]  ;;  %v223_v20 = vadd.f32 %v1119_v3, %v155_v9  ;;  %v224_v21 = vadd.f32 %v1119_v3, %v156_v11  ;;  %v421_v27 = vmul.f32 %v1127_v7, %v881_v17  ;;  %v422_v29 = vmul.f32 %v1127_v7, %v882_v23 }
   0x7   :  { %v419_v14 = vmul.f32 %v1127_v7, %v877_v6  ;;  %v420_v15 = vmul.f32 %v1127_v7, %v878_v8  ;;  %v225_v34 = vadd.f32 %v1119_v3, %v157_v26  ;;  %v226_v36 = vadd.f32 %v1119_v3, %v158_v28  ;;  %v1006_v54 = vld [vmem:[%s1788_s0 + $0x20] sm:$0xff]  }
   0x8   :  { %v489_v35 = vadd.f32 %v1133_v10, %v421_v27  ;;  %v490_v37 = vadd.f32 %v1133_v10, %v422_v29  ;;  %v423_v39 = vmul.f32 %v1127_v7, %v885_v31  ;;  %v227_v47 = vadd.f32 %v1119_v3, %v159_v38  ;;  %v1037_v59 = vld [vmem:[%s1791_s3 + $0x20] sm:$0xff]  }
   0x9   :  { %v487_v24 = vadd.f32 %v1133_v10, %v419_v14  ;;  %v488_v25 = vadd.f32 %v1133_v10, %v420_v15  ;;  %v886_v49 = vunpack.c.h.bf16 %v1035_v19  ;;  %v160_v51 = vmul.f32 %v1114_v1, %v758_v45 }
   0xa   :  { %v553_v44 = vadd.f32 %v489_v35, %v225_v34  ;;  %v554_v46 = vadd.f32 %v490_v37, %v226_v36  ;;  %v491_v48 = vadd.f32 %v1133_v10, %v423_v39  ;;  %v761_v52 = vunpack.c.l.bf16 %v1005_v40  ;;  %v1039_v35 = vld [vmem:[%s1791_s3 + $0x30] sm:$0xff]  }
   0xb   :  { %v551_v32 = vadd.f32 %v487_v24, %v223_v20  ;;  %v552_v33 = vadd.f32 %v488_v25, %v224_v21  ;;  %v889_v53 = vunpack.c.l.bf16 %v1036_v41  ;;  %v424_v57 = vmul.f32 %v1127_v7, %v886_v49  ;;  %v1038_v21 = vld [vmem:[%s1791_s3 + $0x28] sm:$0xff]  }
   0xc   :  { %v617_v50 = vmax.f32 %v553_v44, 0.0  ;;  %v618_v55 = vmax.f32 %v554_v46, 0.0  ;;  %v555_v56 = vadd.f32 %v491_v48, %v227_v47  ;;  %v762_v58 = vunpack.c.h.bf16 %v1005_v40  ;;  %v1009_v48 = vld [vmem:[%s1788_s0 + $0x38] sm:$0xff]  }
   0xd   :  { %v615_v42 = vmax.f32 %v551_v32, 0.0  ;;  %v616_v43 = vmax.f32 %v552_v33, 0.0  ;;  %v228_v60 = vadd.f32 %v1119_v3, %v160_v51  ;;  %v161_v61 = vmul.f32 %v1114_v1, %v761_v52 }
   0xe   :  { %681 = vst [vmem:[%s1794_s6 + $0x10] sm:$0xff] %v617_v50  ;;  %v425_v62 = vmul.f32 %v1127_v7, %v889_v53  ;;  %v890_v63 = vunpack.c.h.bf16 %v1036_v41  ;;  %v619_v0 = vmax.f32 %v555_v56, 0.0  ;;  %v492_v2 = vadd.f32 %v1133_v10, %v424_v57  ;;  %v1040_v53 = vld [vmem:[%s1791_s3 + $0x38] sm:$0xff]  }
   0xf   :  { %679 = vst [vmem:[%s1794_s6] sm:$0xff] %v615_v42  ;;  %v162_v4 = vmul.f32 %v1114_v1, %v762_v58  ;;  %v765_v5 = vunpack.c.l.bf16 %v1006_v54  ;;  %v229_v6 = vadd.f32 %v1119_v3, %v161_v61  ;;  %v893_v11 = vunpack.c.l.bf16 %v1037_v59 }
  0x10   :  { %680 = vst [vmem:[%s1794_s6 + $0x8] sm:$0xff] %v616_v43  ;;  %v493_v8 = vadd.f32 %v1133_v10, %v425_v62  ;;  %v426_v9 = vmul.f32 %v1127_v7, %v890_v63  ;;  %v556_v13 = vadd.f32 %v492_v2, %v228_v60  ;;  %v766_v16 = vunpack.c.h.bf16 %v1006_v54 }
  0x11   :  { %682 = vst [vmem:[%s1794_s6 + $0x18] sm:$0xff] %v618_v55  ;;  %v230_v14 = vadd.f32 %v1119_v3, %v162_v4  ;;  %v163_v15 = vmul.f32 %v1114_v1, %v765_v5  ;;  %v427_v19 = vmul.f32 %v1127_v7, %v893_v11  ;;  %v894_v20 = vunpack.c.h.bf16 %v1037_v59  ;;  %v1010_v4 = vld [vmem:[%s1788_s0 + $0x40] sm:$0xff]  }
  0x12   :  { %683 = vst [vmem:[%s1794_s6 + $0x20] sm:$0xff] %v619_v0  ;;  %v557_v17 = vadd.f32 %v493_v8, %v229_v6  ;;  %v494_v18 = vadd.f32 %v1133_v10, %v426_v9  ;;  %v620_v22 = vmax.f32 %v556_v13, 0.0  ;;  %v164_v24 = vmul.f32 %v1114_v1, %v766_v16  ;;  %v1041_v11 = vld [vmem:[%s1791_s3 + $0x40] sm:$0xff]  }
  0x13   :  { %v231_v23 = vadd.f32 %v1119_v3, %v163_v15  ;;  %v769_v25 = vunpack.c.l.bf16 %v1007_v12  ;;  %v495_v28 = vadd.f32 %v1133_v10, %v427_v19  ;;  %v428_v29 = vmul.f32 %v1127_v7, %v894_v20 }
  0x14   :  { %v621_v26 = vmax.f32 %v557_v17, 0.0  ;;  %v558_v27 = vadd.f32 %v494_v18, %v230_v14  ;;  %684 = vst [vmem:[%s1794_s6 + $0x28] sm:$0xff] %v620_v22  ;;  %v232_v31 = vadd.f32 %v1119_v3, %v164_v24  ;;  %v897_v33 = vunpack.c.l.bf16 %v1038_v21  ;;  %v1011_v24 = vld [vmem:[%s1788_s0 + $0x48] sm:$0xff]  }
  0x15   :  { %v165_v32 = vmul.f32 %v1114_v1, %v769_v25  ;;  %v770_v34 = vunpack.c.h.bf16 %v1007_v12  ;;  %v559_v37 = vadd.f32 %v495_v28, %v231_v23  ;;  %v496_v38 = vadd.f32 %v1133_v10, %v428_v29  ;;  %v1042_v29 = vld [vmem:[%s1791_s3 + $0x48] sm:$0xff]  }
  0x16   :  { %685 = vst [vmem:[%s1794_s6 + $0x30] sm:$0xff] %v621_v26  ;;  %v622_v36 = vmax.f32 %v558_v27, 0.0  ;;  %v898_v39 = vunpack.c.h.bf16 %v1038_v21  ;;  %v429_v41 = vmul.f32 %v1127_v7, %v897_v33  ;;  %v773_v43 = vunpack.c.l.bf16 %v1008_v30 }
  0x17   :  { %v233_v40 = vadd.f32 %v1119_v3, %v165_v32  ;;  %v166_v42 = vmul.f32 %v1114_v1, %v770_v34  ;;  %v623_v44 = vmax.f32 %v559_v37, 0.0  ;;  %v560_v45 = vadd.f32 %v496_v38, %v232_v31 }
  0x18   :  { %686 = vst [vmem:[%s1794_s6 + $0x38] sm:$0xff] %v622_v36  ;;  %v430_v46 = vmul.f32 %v1127_v7, %v898_v39  ;;  %v901_v47 = vunpack.c.l.bf16 %v1039_v35  ;;  %v497_v49 = vadd.f32 %v1133_v10, %v429_v41  ;;  %v167_v51 = vmul.f32 %v1114_v1, %v773_v43 }
  0x19   :  { %v234_v50 = vadd.f32 %v1119_v3, %v166_v42  ;;  %v774_v52 = vunpack.c.h.bf16 %v1008_v30  ;;  %687 = vst [vmem:[%s1794_s6 + $0x40] sm:$0xff] %v623_v44  ;;  %v624_v54 = vmax.f32 %v560_v45, 0.0  ;;  %v902_v57 = vunpack.c.h.bf16 %v1039_v35  ;;  %v1012_v42 = vld [vmem:[%s1788_s0 + $0x50] sm:$0xff]  }
  0x1a   :  { %v498_v55 = vadd.f32 %v1133_v10, %v430_v46  ;;  %v431_v56 = vmul.f32 %v1127_v7, %v901_v47  ;;  %v561_v58 = vadd.f32 %v497_v49, %v233_v40  ;;  %v235_v59 = vadd.f32 %v1119_v3, %v167_v51  ;;  %v1043_v51 = vld [vmem:[%s1791_s3 + $0x50] sm:$0xff]  }
  0x1b   :  { %v168_v60 = vmul.f32 %v1114_v1, %v774_v52  ;;  %v777_v61 = vunpack.c.l.bf16 %v1009_v48  ;;  %688 = vst [vmem:[%s1794_s6 + $0x48] sm:$0xff] %v624_v54  ;;  %v432_v0 = vmul.f32 %v1127_v7, %v902_v57  ;;  %v905_v2 = vunpack.c.l.bf16 %v1040_v53 }
  0x1c   :  { %v562_v62 = vadd.f32 %v498_v55, %v234_v50  ;;  %v499_v63 = vadd.f32 %v1133_v10, %v431_v56  ;;  %v625_v5 = vmax.f32 %v561_v58, 0.0  ;;  %v778_v9 = vunpack.c.h.bf16 %v1009_v48 }
  0x1d   :  { %v236_v6 = vadd.f32 %v1119_v3, %v168_v60  ;;  %v169_v8 = vmul.f32 %v1114_v1, %v777_v61  ;;  %v500_v14 = vadd.f32 %v1133_v10, %v432_v0  ;;  %v433_v15 = vmul.f32 %v1127_v7, %v905_v2  ;;  %v1013_v60 = vld [vmem:[%s1788_s0 + $0x58] sm:$0xff]  }
  0x1e   :  { %v626_v12 = vmax.f32 %v562_v62, 0.0  ;;  %v563_v13 = vadd.f32 %v499_v63, %v235_v59  ;;  %689 = vst [vmem:[%s1794_s6 + $0x50] sm:$0xff] %v625_v5  ;;  %v170_v17 = vmul.f32 %v1114_v1, %v778_v9  ;;  %v906_v18 = vunpack.c.h.bf16 %v1040_v53  ;;  %v1044_v2 = vld [vmem:[%s1791_s3 + $0x58] sm:$0xff]  }
  0x1f   :  { %v237_v16 = vadd.f32 %v1119_v3, %v169_v8  ;;  %v781_v19 = vunpack.c.l.bf16 %v1010_v4  ;;  %v564_v21 = vadd.f32 %v500_v14, %v236_v6  ;;  %v501_v22 = vadd.f32 %v1133_v10, %v433_v15 }
  0x20   :  { %690 = vst [vmem:[%s1794_s6 + $0x58] sm:$0xff] %v626_v12  ;;  %v627_v20 = vmax.f32 %v563_v13, 0.0  ;;  %v909_v23 = vunpack.c.l.bf16 %v1041_v11  ;;  %v238_v25 = vadd.f32 %v1119_v3, %v170_v17  ;;  %v434_v26 = vmul.f32 %v1127_v7, %v906_v18  ;;  %v1014_v18 = vld [vmem:[%s1788_s0 + $0x60] sm:$0xff]  }
  0x21   :  { %v171_v27 = vmul.f32 %v1114_v1, %v781_v19  ;;  %v782_v28 = vunpack.c.h.bf16 %v1010_v4  ;;  %v628_v30 = vmax.f32 %v564_v21, 0.0  ;;  %v565_v31 = vadd.f32 %v501_v22, %v237_v16 }
  0x22   :  { %691 = vst [vmem:[%s1794_s6 + $0x60] sm:$0xff] %v627_v20  ;;  %v435_v32 = vmul.f32 %v1127_v7, %v909_v23  ;;  %v910_v33 = vunpack.c.h.bf16 %v1041_v11  ;;  %v502_v34 = vadd.f32 %v1133_v10, %v434_v26  ;;  %v785_v37 = vunpack.c.l.bf16 %v1011_v24  ;;  %v1045_v23 = vld [vmem:[%s1791_s3 + $0x60] sm:$0xff]  }
  0x23   :  { %v239_v35 = vadd.f32 %v1119_v3, %v171_v27  ;;  %v172_v36 = vmul.f32 %v1114_v1, %v782_v28  ;;  %692 = vst [vmem:[%s1794_s6 + $0x68] sm:$0xff] %v628_v30  ;;  %v629_v38 = vmax.f32 %v565_v31, 0.0  ;;  %v913_v41 = vunpack.c.l.bf16 %v1042_v29 }
  0x24   :  { %v503_v39 = vadd.f32 %v1133_v10, %v435_v32  ;;  %v436_v40 = vmul.f32 %v1127_v7, %v910_v33  ;;  %v566_v43 = vadd.f32 %v502_v34, %v238_v25  ;;  %v173_v45 = vmul.f32 %v1114_v1, %v785_v37 }
  0x25   :  { %v240_v44 = vadd.f32 %v1119_v3, %v172_v36  ;;  %v786_v46 = vunpack.c.h.bf16 %v1011_v24  ;;  %693 = vst [vmem:[%s1794_s6 + $0x70] sm:$0xff] %v629_v38  ;;  %v437_v49 = vmul.f32 %v1127_v7, %v913_v41  ;;  %v914_v50 = vunpack.c.h.bf16 %v1042_v29  ;;  %v1015_v36 = vld [vmem:[%s1788_s0 + $0x68] sm:$0xff]  }
  0x26   :  { %v567_v47 = vadd.f32 %v503_v39, %v239_v35  ;;  %v504_v48 = vadd.f32 %v1133_v10, %v436_v40  ;;  %v630_v52 = vmax.f32 %v566_v43, 0.0  ;;  %v241_v53 = vadd.f32 %v1119_v3, %v173_v45  ;;  %v1046_v41 = vld [vmem:[%s1791_s3 + $0x68] sm:$0xff]  }
  0x27   :  { %v174_v54 = vmul.f32 %v1114_v1, %v786_v46  ;;  %v789_v55 = vunpack.c.l.bf16 %v1012_v42  ;;  %v505_v58 = vadd.f32 %v1133_v10, %v437_v49  ;;  %v438_v59 = vmul.f32 %v1127_v7, %v914_v50 }
  0x28   :  { %v631_v56 = vmax.f32 %v567_v47, 0.0  ;;  %v568_v57 = vadd.f32 %v504_v48, %v240_v44  ;;  %694 = vst [vmem:[%s1794_s6 + $0x78] sm:$0xff] %v630_v52  ;;  %v917_v63 = vunpack.c.l.bf16 %v1043_v51  ;;  %v790_v0 = vunpack.c.h.bf16 %v1012_v42 }
  0x29   :  { %v242_v61 = vadd.f32 %v1119_v3, %v174_v54  ;;  %v175_v62 = vmul.f32 %v1114_v1, %v789_v55  ;;  %v569_v5 = vadd.f32 %v505_v58, %v241_v53  ;;  %v506_v6 = vadd.f32 %v1133_v10, %v438_v59  ;;  %v1016_v54 = vld [vmem:[%s1788_s0 + $0x70] sm:$0xff]  }
  0x2a   :  { %695 = vst [vmem:[%s1794_s6 + $0x80] sm:$0xff] %v631_v56  ;;  %v632_v4 = vmax.f32 %v568_v57, 0.0  ;;  %v918_v8 = vunpack.c.h.bf16 %v1043_v51  ;;  %v439_v11 = vmul.f32 %v1127_v7, %v917_v63  ;;  %v176_v12 = vmul.f32 %v1114_v1, %v790_v0  ;;  %v1047_v59 = vld [vmem:[%s1791_s3 + $0x70] sm:$0xff]  }
  0x2b   :  { %v243_v9 = vadd.f32 %v1119_v3, %v175_v62  ;;  %v793_v13 = vunpack.c.l.bf16 %v1013_v60  ;;  %v633_v14 = vmax.f32 %v569_v5, 0.0  ;;  %v570_v15 = vadd.f32 %v506_v6, %v242_v61 }
  0x2c   :  { %696 = vst [vmem:[%s1794_s6 + $0x88] sm:$0xff] %v632_v4  ;;  %v440_v16 = vmul.f32 %v1127_v7, %v918_v8  ;;  %v921_v17 = vunpack.c.l.bf16 %v1044_v2  ;;  %v507_v19 = vadd.f32 %v1133_v10, %v439_v11  ;;  %v244_v20 = vadd.f32 %v1119_v3, %v176_v12  ;;  %v1017_v12 = vld [vmem:[%s1788_s0 + $0x78] sm:$0xff]  }
  0x2d   :  { %v177_v21 = vmul.f32 %v1114_v1, %v793_v13  ;;  %v794_v22 = vunpack.c.h.bf16 %v1013_v60  ;;  %697 = vst [vmem:[%s1794_s6 + $0x90] sm:$0xff] %v633_v14  ;;  %v634_v24 = vmax.f32 %v570_v15, 0.0  ;;  %v922_v27 = vunpack.c.h.bf16 %v1044_v2 }
  0x2e   :  { %v508_v25 = vadd.f32 %v1133_v10, %v440_v16  ;;  %v441_v26 = vmul.f32 %v1127_v7, %v921_v17  ;;  %v571_v28 = vadd.f32 %v507_v19, %v243_v9  ;;  %v797_v31 = vunpack.c.l.bf16 %v1014_v18 }
  0x2f   :  { %v245_v29 = vadd.f32 %v1119_v3, %v177_v21  ;;  %v178_v30 = vmul.f32 %v1114_v1, %v794_v22  ;;  %698 = vst [vmem:[%s1794_s6 + $0x98] sm:$0xff] %v634_v24  ;;  %v442_v34 = vmul.f32 %v1127_v7, %v922_v27  ;;  %v925_v35 = vunpack.c.l.bf16 %v1045_v23  ;;  %v1048_v21 = vld [vmem:[%s1791_s3 + $0x78] sm:$0xff]  }
  0x30   :  { %v572_v32 = vadd.f32 %v508_v25, %v244_v20  ;;  %v509_v33 = vadd.f32 %v1133_v10, %v441_v26  ;;  %v635_v37 = vmax.f32 %v571_v28, 0.0  ;;  %v179_v39 = vmul.f32 %v1114_v1, %v797_v31 }
  0x31   :  { %v246_v38 = vadd.f32 %v1119_v3, %v178_v30  ;;  %v798_v40 = vunpack.c.h.bf16 %v1014_v18  ;;  %v510_v44 = vadd.f32 %v1133_v10, %v442_v34  ;;  %v443_v45 = vmul.f32 %v1127_v7, %v925_v35  ;;  %v1018_v30 = vld [vmem:[%s1788_s0 + $0x80] sm:$0xff]  }
  0x32   :  { %v636_v42 = vmax.f32 %v572_v32, 0.0  ;;  %v573_v43 = vadd.f32 %v509_v33, %v245_v29  ;;  %699 = vst [vmem:[%s1794_s6 + $0xa0] sm:$0xff] %v635_v37  ;;  %v247_v46 = vadd.f32 %v1119_v3, %v179_v39  ;;  %v926_v48 = vunpack.c.h.bf16 %v1045_v23  ;;  %v1049_v35 = vld [vmem:[%s1791_s3 + $0x80] sm:$0xff]  }
  0x33   :  { %v180_v47 = vmul.f32 %v1114_v1, %v798_v40  ;;  %v801_v49 = vunpack.c.l.bf16 %v1015_v36  ;;  %v574_v51 = vadd.f32 %v510_v44, %v246_v38  ;;  %v511_v52 = vadd.f32 %v1133_v10, %v443_v45 }
  0x34   :  { %700 = vst [vmem:[%s1794_s6 + $0xa8] sm:$0xff] %v636_v42  ;;  %v637_v50 = vmax.f32 %v573_v43, 0.0  ;;  %v929_v53 = vunpack.c.l.bf16 %v1046_v41  ;;  %v444_v56 = vmul.f32 %v1127_v7, %v926_v48  ;;  %v802_v58 = vunpack.c.h.bf16 %v1015_v36  ;;  %v1019_v48 = vld [vmem:[%s1788_s0 + $0x88] sm:$0xff]  }
  0x35   :  { %v248_v55 = vadd.f32 %v1119_v3, %v180_v47  ;;  %v181_v57 = vmul.f32 %v1114_v1, %v801_v49  ;;  %v638_v60 = vmax.f32 %v574_v51, 0.0  ;;  %v575_v61 = vadd.f32 %v511_v52, %v247_v46 }
  0x36   :  { %701 = vst [vmem:[%s1794_s6 + $0xb0] sm:$0xff] %v637_v50  ;;  %v445_v62 = vmul.f32 %v1127_v7, %v929_v53  ;;  %v930_v63 = vunpack.c.h.bf16 %v1046_v41  ;;  %v512_v0 = vadd.f32 %v1133_v10, %v444_v56  ;;  %v182_v4 = vmul.f32 %v1114_v1, %v802_v58  ;;  %v1050_v53 = vld [vmem:[%s1791_s3 + $0x88] sm:$0xff]  }
  0x37   :  { %v249_v2 = vadd.f32 %v1119_v3, %v181_v57  ;;  %v805_v5 = vunpack.c.l.bf16 %v1016_v54  ;;  %702 = vst [vmem:[%s1794_s6 + $0xb8] sm:$0xff] %v638_v60  ;;  %v639_v6 = vmax.f32 %v575_v61, 0.0  ;;  %v933_v11 = vunpack.c.l.bf16 %v1047_v59 }
  0x38   :  { %v513_v8 = vadd.f32 %v1133_v10, %v445_v62  ;;  %v446_v9 = vmul.f32 %v1127_v7, %v930_v63  ;;  %v576_v13 = vadd.f32 %v512_v0, %v248_v55  ;;  %v250_v14 = vadd.f32 %v1119_v3, %v182_v4  ;;  %v1020_v4 = vld [vmem:[%s1788_s0 + $0x90] sm:$0xff]  }
  0x39   :  { %v183_v15 = vmul.f32 %v1114_v1, %v805_v5  ;;  %v806_v16 = vunpack.c.h.bf16 %v1016_v54  ;;  %703 = vst [vmem:[%s1794_s6 + $0xc0] sm:$0xff] %v639_v6  ;;  %v447_v19 = vmul.f32 %v1127_v7, %v933_v11  ;;  %v934_v20 = vunpack.c.h.bf16 %v1047_v59  ;;  %v1051_v11 = vld [vmem:[%s1791_s3 + $0x90] sm:$0xff]  }
  0x3a   :  { %v577_v17 = vadd.f32 %v513_v8, %v249_v2  ;;  %v514_v18 = vadd.f32 %v1133_v10, %v446_v9  ;;  %v640_v22 = vmax.f32 %v576_v13, 0.0  ;;  %v809_v25 = vunpack.c.l.bf16 %v1017_v12 }
  0x3b   :  { %v251_v23 = vadd.f32 %v1119_v3, %v183_v15  ;;  %v184_v24 = vmul.f32 %v1114_v1, %v806_v16  ;;  %v515_v28 = vadd.f32 %v1133_v10, %v447_v19  ;;  %v448_v29 = vmul.f32 %v1127_v7, %v934_v20 }
  0x3c   :  { %v641_v26 = vmax.f32 %v577_v17, 0.0  ;;  %v578_v27 = vadd.f32 %v514_v18, %v250_v14  ;;  %704 = vst [vmem:[%s1794_s6 + $0xc8] sm:$0xff] %v640_v22  ;;  %v185_v32 = vmul.f32 %v1114_v1, %v809_v25  ;;  %v937_v33 = vunpack.c.l.bf16 %v1048_v21 }
  0x3d   :  { %v252_v31 = vadd.f32 %v1119_v3, %v184_v24  ;;  %v810_v34 = vunpack.c.h.bf16 %v1017_v12  ;;  %v579_v37 = vadd.f32 %v515_v28, %v251_v23  ;;  %v516_v38 = vadd.f32 %v1133_v10, %v448_v29  ;;  %v1021_v24 = vld [vmem:[%s1788_s0 + $0x98] sm:$0xff]  }
  0x3e   :  { %705 = vst [vmem:[%s1794_s6 + $0xd0] sm:$0xff] %v641_v26  ;;  %v642_v36 = vmax.f32 %v578_v27, 0.0  ;;  %v938_v39 = vunpack.c.h.bf16 %v1048_v21  ;;  %v253_v40 = vadd.f32 %v1119_v3, %v185_v32  ;;  %v449_v41 = vmul.f32 %v1127_v7, %v937_v33  ;;  %v1052_v29 = vld [vmem:[%s1791_s3 + $0x98] sm:$0xff]  }
  0x3f   :  { %v186_v42 = vmul.f32 %v1114_v1, %v810_v34  ;;  %v813_v43 = vunpack.c.l.bf16 %v1018_v30  ;;  %v643_v44 = vmax.f32 %v579_v37, 0.0  ;;  %v580_v45 = vadd.f32 %v516_v38, %v252_v31 }
  0x40   :  { %706 = vst [vmem:[%s1794_s6 + $0xd8] sm:$0xff] %v642_v36  ;;  %v450_v46 = vmul.f32 %v1127_v7, %v938_v39  ;;  %v941_v47 = vunpack.c.l.bf16 %v1049_v35  ;;  %v517_v49 = vadd.f32 %v1133_v10, %v449_v41  ;;  %v814_v52 = vunpack.c.h.bf16 %v1018_v30 }
  0x41   :  { %v254_v50 = vadd.f32 %v1119_v3, %v186_v42  ;;  %v187_v51 = vmul.f32 %v1114_v1, %v813_v43  ;;  %707 = vst [vmem:[%s1794_s6 + $0xe0] sm:$0xff] %v643_v44  ;;  %v644_v54 = vmax.f32 %v580_v45, 0.0  ;;  %v942_v57 = vunpack.c.h.bf16 %v1049_v35  ;;  %v1022_v42 = vld [vmem:[%s1788_s0 + $0xa0] sm:$0xff]  }
  0x42   :  { %v518_v55 = vadd.f32 %v1133_v10, %v450_v46  ;;  %v451_v56 = vmul.f32 %v1127_v7, %v941_v47  ;;  %v581_v58 = vadd.f32 %v517_v49, %v253_v40  ;;  %v188_v60 = vmul.f32 %v1114_v1, %v814_v52 }
  0x43   :  { %v255_v59 = vadd.f32 %v1119_v3, %v187_v51  ;;  %v817_v61 = vunpack.c.l.bf16 %v1019_v48  ;;  %708 = vst [vmem:[%s1794_s6 + $0xe8] sm:$0xff] %v644_v54  ;;  %v452_v0 = vmul.f32 %v1127_v7, %v942_v57  ;;  %v945_v2 = vunpack.c.l.bf16 %v1050_v53  ;;  %v1053_v51 = vld [vmem:[%s1791_s3 + $0xa0] sm:$0xff]  }
  0x44   :  { %v582_v62 = vadd.f32 %v518_v55, %v254_v50  ;;  %v519_v63 = vadd.f32 %v1133_v10, %v451_v56  ;;  %v645_v5 = vmax.f32 %v581_v58, 0.0  ;;  %v256_v6 = vadd.f32 %v1119_v3, %v188_v60  ;;  %v1023_v60 = vld [vmem:[%s1788_s0 + $0xa8] sm:$0xff]  }
  0x45   :  { %v189_v8 = vmul.f32 %v1114_v1, %v817_v61  ;;  %v818_v9 = vunpack.c.h.bf16 %v1019_v48  ;;  %v520_v14 = vadd.f32 %v1133_v10, %v452_v0  ;;  %v453_v15 = vmul.f32 %v1127_v7, %v945_v2  ;;  %v1054_v2 = vld [vmem:[%s1791_s3 + $0xa8] sm:$0xff]  }
  0x46   :  { %v646_v12 = vmax.f32 %v582_v62, 0.0  ;;  %v583_v13 = vadd.f32 %v519_v63, %v255_v59  ;;  %709 = vst [vmem:[%s1794_s6 + $0xf0] sm:$0xff] %v645_v5  ;;  %v946_v18 = vunpack.c.h.bf16 %v1050_v53  ;;  %v821_v19 = vunpack.c.l.bf16 %v1020_v4 }
  0x47   :  { %v257_v16 = vadd.f32 %v1119_v3, %v189_v8  ;;  %v190_v17 = vmul.f32 %v1114_v1, %v818_v9  ;;  %v584_v21 = vadd.f32 %v520_v14, %v256_v6  ;;  %v521_v22 = vadd.f32 %v1133_v10, %v453_v15 }
  0x48   :  { %710 = vst [vmem:[%s1794_s6 + $0xf8] sm:$0xff] %v646_v12  ;;  %v647_v20 = vmax.f32 %v583_v13, 0.0  ;;  %v949_v23 = vunpack.c.l.bf16 %v1051_v11  ;;  %v454_v26 = vmul.f32 %v1127_v7, %v946_v18  ;;  %v191_v27 = vmul.f32 %v1114_v1, %v821_v19  ;;  %v1024_v18 = vld [vmem:[%s1788_s0 + $0xb0] sm:$0xff]  }
  0x49   :  { %v258_v25 = vadd.f32 %v1119_v3, %v190_v17  ;;  %v822_v28 = vunpack.c.h.bf16 %v1020_v4  ;;  %v648_v30 = vmax.f32 %v584_v21, 0.0  ;;  %v585_v31 = vadd.f32 %v521_v22, %v257_v16 }
  0x4a   :  { %711 = vst [vmem:[%s1794_s6 + $0x100] sm:$0xff] %v647_v20  ;;  %v455_v32 = vmul.f32 %v1127_v7, %v949_v23  ;;  %v950_v33 = vunpack.c.h.bf16 %v1051_v11  ;;  %v522_v34 = vadd.f32 %v1133_v10, %v454_v26  ;;  %v259_v35 = vadd.f32 %v1119_v3, %v191_v27  ;;  %v1055_v23 = vld [vmem:[%s1791_s3 + $0xb0] sm:$0xff]  }
  0x4b   :  { %v192_v36 = vmul.f32 %v1114_v1, %v822_v28  ;;  %v825_v37 = vunpack.c.l.bf16 %v1021_v24  ;;  %712 = vst [vmem:[%s1794_s6 + $0x108] sm:$0xff] %v648_v30  ;;  %v649_v38 = vmax.f32 %v585_v31, 0.0  ;;  %v953_v41 = vunpack.c.l.bf16 %v1052_v29 }
  0x4c   :  { %v523_v39 = vadd.f32 %v1133_v10, %v455_v32  ;;  %v456_v40 = vmul.f32 %v1127_v7, %v950_v33  ;;  %v586_v43 = vadd.f32 %v522_v34, %v258_v25  ;;  %v826_v46 = vunpack.c.h.bf16 %v1021_v24 }
  0x4d   :  { %v260_v44 = vadd.f32 %v1119_v3, %v192_v36  ;;  %v193_v45 = vmul.f32 %v1114_v1, %v825_v37  ;;  %713 = vst [vmem:[%s1794_s6 + $0x110] sm:$0xff] %v649_v38  ;;  %v457_v49 = vmul.f32 %v1127_v7, %v953_v41  ;;  %v954_v50 = vunpack.c.h.bf16 %v1052_v29  ;;  %v1025_v36 = vld [vmem:[%s1788_s0 + $0xb8] sm:$0xff]  }
  0x4e   :  { %v587_v47 = vadd.f32 %v523_v39, %v259_v35  ;;  %v524_v48 = vadd.f32 %v1133_v10, %v456_v40  ;;  %v650_v52 = vmax.f32 %v586_v43, 0.0  ;;  %v194_v54 = vmul.f32 %v1114_v1, %v826_v46  ;;  %v1056_v41 = vld [vmem:[%s1791_s3 + $0xb8] sm:$0xff]  }
  0x4f   :  { %v261_v53 = vadd.f32 %v1119_v3, %v193_v45  ;;  %v829_v55 = vunpack.c.l.bf16 %v1022_v42  ;;  %v525_v58 = vadd.f32 %v1133_v10, %v457_v49  ;;  %v458_v59 = vmul.f32 %v1127_v7, %v954_v50 }
  0x50   :  { %v651_v56 = vmax.f32 %v587_v47, 0.0  ;;  %v588_v57 = vadd.f32 %v524_v48, %v260_v44  ;;  %714 = vst [vmem:[%s1794_s6 + $0x118] sm:$0xff] %v650_v52  ;;  %v262_v61 = vadd.f32 %v1119_v3, %v194_v54  ;;  %v957_v63 = vunpack.c.l.bf16 %v1053_v51  ;;  %v1026_v54 = vld [vmem:[%s1788_s0 + $0xc0] sm:$0xff]  }
  0x51   :  { %v195_v62 = vmul.f32 %v1114_v1, %v829_v55  ;;  %v830_v0 = vunpack.c.h.bf16 %v1022_v42  ;;  %v589_v5 = vadd.f32 %v525_v58, %v261_v53  ;;  %v526_v6 = vadd.f32 %v1133_v10, %v458_v59  ;;  %v1057_v59 = vld [vmem:[%s1791_s3 + $0xc0] sm:$0xff]  }
  0x52   :  { %715 = vst [vmem:[%s1794_s6 + $0x120] sm:$0xff] %v651_v56  ;;  %v652_v4 = vmax.f32 %v588_v57, 0.0  ;;  %v958_v8 = vunpack.c.h.bf16 %v1053_v51  ;;  %v459_v11 = vmul.f32 %v1127_v7, %v957_v63  ;;  %v833_v13 = vunpack.c.l.bf16 %v1023_v60 }
  0x53   :  { %v263_v9 = vadd.f32 %v1119_v3, %v195_v62  ;;  %v196_v12 = vmul.f32 %v1114_v1, %v830_v0  ;;  %v653_v14 = vmax.f32 %v589_v5, 0.0  ;;  %v590_v15 = vadd.f32 %v526_v6, %v262_v61 }
  0x54   :  { %716 = vst [vmem:[%s1794_s6 + $0x128] sm:$0xff] %v652_v4  ;;  %v460_v16 = vmul.f32 %v1127_v7, %v958_v8  ;;  %v961_v17 = vunpack.c.l.bf16 %v1054_v2  ;;  %v527_v19 = vadd.f32 %v1133_v10, %v459_v11  ;;  %v197_v21 = vmul.f32 %v1114_v1, %v833_v13 }
  0x55   :  { %v264_v20 = vadd.f32 %v1119_v3, %v196_v12  ;;  %v834_v22 = vunpack.c.h.bf16 %v1023_v60  ;;  %717 = vst [vmem:[%s1794_s6 + $0x130] sm:$0xff] %v653_v14  ;;  %v654_v24 = vmax.f32 %v590_v15, 0.0  ;;  %v962_v27 = vunpack.c.h.bf16 %v1054_v2  ;;  %v1027_v12 = vld [vmem:[%s1788_s0 + $0xc8] sm:$0xff]  }
  0x56   :  { %v528_v25 = vadd.f32 %v1133_v10, %v460_v16  ;;  %v461_v26 = vmul.f32 %v1127_v7, %v961_v17  ;;  %v591_v28 = vadd.f32 %v527_v19, %v263_v9  ;;  %v265_v29 = vadd.f32 %v1119_v3, %v197_v21  ;;  %v1058_v21 = vld [vmem:[%s1791_s3 + $0xc8] sm:$0xff]  }
  0x57   :  { %v198_v30 = vmul.f32 %v1114_v1, %v834_v22  ;;  %v837_v31 = vunpack.c.l.bf16 %v1024_v18  ;;  %718 = vst [vmem:[%s1794_s6 + $0x138] sm:$0xff] %v654_v24  ;;  %v462_v34 = vmul.f32 %v1127_v7, %v962_v27  ;;  %v965_v35 = vunpack.c.l.bf16 %v1055_v23 }
  0x58   :  { %v592_v32 = vadd.f32 %v528_v25, %v264_v20  ;;  %v529_v33 = vadd.f32 %v1133_v10, %v461_v26  ;;  %v655_v37 = vmax.f32 %v591_v28, 0.0  ;;  %v838_v40 = vunpack.c.h.bf16 %v1024_v18 }
  0x59   :  { %v266_v38 = vadd.f32 %v1119_v3, %v198_v30  ;;  %v199_v39 = vmul.f32 %v1114_v1, %v837_v31  ;;  %v530_v44 = vadd.f32 %v1133_v10, %v462_v34  ;;  %v463_v45 = vmul.f32 %v1127_v7, %v965_v35  ;;  %v1028_v30 = vld [vmem:[%s1788_s0 + $0xd0] sm:$0xff]  }
  0x5a   :  { %v656_v42 = vmax.f32 %v592_v32, 0.0  ;;  %v593_v43 = vadd.f32 %v529_v33, %v265_v29  ;;  %719 = vst [vmem:[%s1794_s6 + $0x140] sm:$0xff] %v655_v37  ;;  %v200_v47 = vmul.f32 %v1114_v1, %v838_v40  ;;  %v966_v48 = vunpack.c.h.bf16 %v1055_v23  ;;  %v1059_v35 = vld [vmem:[%s1791_s3 + $0xd0] sm:$0xff]  }
  0x5b   :  { %v267_v46 = vadd.f32 %v1119_v3, %v199_v39  ;;  %v841_v49 = vunpack.c.l.bf16 %v1025_v36  ;;  %v594_v51 = vadd.f32 %v530_v44, %v266_v38  ;;  %v531_v52 = vadd.f32 %v1133_v10, %v463_v45 }
  0x5c   :  { %720 = vst [vmem:[%s1794_s6 + $0x148] sm:$0xff] %v656_v42  ;;  %v657_v50 = vmax.f32 %v593_v43, 0.0  ;;  %v969_v53 = vunpack.c.l.bf16 %v1056_v41  ;;  %v268_v55 = vadd.f32 %v1119_v3, %v200_v47  ;;  %v464_v56 = vmul.f32 %v1127_v7, %v966_v48 }
  0x5d   :  { %v201_v57 = vmul.f32 %v1114_v1, %v841_v49  ;;  %v842_v58 = vunpack.c.h.bf16 %v1025_v36  ;;  %v658_v60 = vmax.f32 %v594_v51, 0.0  ;;  %v595_v61 = vadd.f32 %v531_v52, %v267_v46  ;;  %v1651_v49 = vld [vmem:[%s1790_s2] ss:$0 sm:$0xff] }
  0x5e   :  { %721 = vst [vmem:[%s1794_s6 + $0x150] sm:$0xff] %v657_v50  ;;  %v465_v62 = vmul.f32 %v1127_v7, %v969_v53  ;;  %v970_v63 = vunpack.c.h.bf16 %v1056_v41  ;;  %v532_v0 = vadd.f32 %v1133_v10, %v464_v56  ;;  %v845_v5 = vunpack.c.l.bf16 %v1026_v54 }
  0x5f   :  { %v269_v2 = vadd.f32 %v1119_v3, %v201_v57  ;;  %v202_v4 = vmul.f32 %v1114_v1, %v842_v58  ;;  %722 = vst [vmem:[%s1794_s6 + $0x158] sm:$0xff] %v658_v60  ;;  %v659_v6 = vmax.f32 %v595_v61, 0.0  ;;  %v973_v11 = vunpack.c.l.bf16 %v1057_v59 }
  0x60   :  { %v533_v8 = vadd.f32 %v1133_v10, %v465_v62  ;;  %v466_v9 = vmul.f32 %v1127_v7, %v970_v63  ;;  %v596_v13 = vadd.f32 %v532_v0, %v268_v55  ;;  %v203_v15 = vmul.f32 %v1114_v1, %v845_v5  ;;  %v1670_v55 = vld [vmem:[%s1792_s4] ss:$0 sm:$0xff] }
  0x61   :  { %v270_v14 = vadd.f32 %v1119_v3, %v202_v4  ;;  %v846_v16 = vunpack.c.h.bf16 %v1026_v54  ;;  %723 = vst [vmem:[%s1794_s6 + $0x160] sm:$0xff] %v659_v6  ;;  %v467_v19 = vmul.f32 %v1127_v7, %v973_v11  ;;  %v974_v20 = vunpack.c.h.bf16 %v1057_v59  ;;  %v1030_v4 = vld [vmem:[%s1788_s0 + $0xe0] sm:$0xff]  }
  0x62   :  { %v597_v17 = vadd.f32 %v533_v8, %v269_v2  ;;  %v534_v18 = vadd.f32 %v1133_v10, %v466_v9  ;;  %v660_v22 = vmax.f32 %v596_v13, 0.0  ;;  %v271_v23 = vadd.f32 %v1119_v3, %v203_v15  ;;  %v1061_v11 = vld [vmem:[%s1791_s3 + $0xe0] sm:$0xff]  }
  0x63   :  { %v204_v24 = vmul.f32 %v1114_v1, %v846_v16  ;;  %v849_v25 = vunpack.c.l.bf16 %v1027_v12  ;;  %v535_v28 = vadd.f32 %v1133_v10, %v467_v19  ;;  %v468_v29 = vmul.f32 %v1127_v7, %v974_v20 }
  0x64   :  { %v661_v26 = vmax.f32 %v597_v17, 0.0  ;;  %v598_v27 = vadd.f32 %v534_v18, %v270_v14  ;;  %724 = vst [vmem:[%s1794_s6 + $0x168] sm:$0xff] %v660_v22  ;;  %v977_v33 = vunpack.c.l.bf16 %v1058_v21  ;;  %v850_v34 = vunpack.c.h.bf16 %v1027_v12 }
  0x65   :  { %v272_v31 = vadd.f32 %v1119_v3, %v204_v24  ;;  %v205_v32 = vmul.f32 %v1114_v1, %v849_v25  ;;  %v599_v37 = vadd.f32 %v535_v28, %v271_v23  ;;  %v536_v38 = vadd.f32 %v1133_v10, %v468_v29  ;;  %v1637_v1 = vld [vmem:[%s1789_s1] ss:$0 sm:$0xff]  ;;  %v1031_v24 = vld [vmem:[%s1788_s0 + $0xe8] sm:$0xff]  }
  0x66   :  { %725 = vst [vmem:[%s1794_s6 + $0x170] sm:$0xff] %v661_v26  ;;  %v662_v36 = vmax.f32 %v598_v27, 0.0  ;;  %v978_v39 = vunpack.c.h.bf16 %v1058_v21  ;;  %v469_v41 = vmul.f32 %v1127_v7, %v977_v33  ;;  %v206_v42 = vmul.f32 %v1637_v1, %v850_v34  ;;  %v1062_v29 = vld [vmem:[%s1791_s3 + $0xe8] sm:$0xff]  }
  0x67   :  { %v273_v40 = vadd.f32 %v1119_v3, %v205_v32  ;;  %v853_v43 = vunpack.c.l.bf16 %v1028_v30  ;;  %v663_v44 = vmax.f32 %v599_v37, 0.0  ;;  %v600_v45 = vadd.f32 %v536_v38, %v272_v31  ;;  %v1029_v3 = vld [vmem:[%s1788_s0 + $0xd8] sm:$0xff]  }
  0x68   :  { %726 = vst [vmem:[%s1794_s6 + $0x178] sm:$0xff] %v662_v36  ;;  %v470_v46 = vmul.f32 %v1127_v7, %v978_v39  ;;  %v981_v47 = vunpack.c.l.bf16 %v1059_v35  ;;  %v537_v48 = vadd.f32 %v1133_v10, %v469_v41  ;;  %v274_v50 = vadd.f32 %v1651_v49, %v206_v42  ;;  %v1060_v7 = vld [vmem:[%s1791_s3 + $0xd8] sm:$0xff]   ;;  %v1664_v10 = vld [vmem:[%s1793_s5] ss:$0 sm:$0xff]  ;;  %v1032_v42 = vld [vmem:[%s1788_s0 + $0xf0] sm:$0xff]  }
  0x69   :  { %v207_v51 = vmul.f32 %v1637_v1, %v853_v43  ;;  %v854_v52 = vunpack.c.h.bf16 %v1028_v30  ;;  %727 = vst [vmem:[%s1794_s6 + $0x180] sm:$0xff] %v663_v44  ;;  %v664_v53 = vmax.f32 %v600_v45, 0.0  ;;  %v982_v57 = vunpack.c.h.bf16 %v1059_v35 }
  0x6a   :  { %v538_v54 = vadd.f32 %v1664_v10, %v470_v46  ;;  %v471_v56 = vmul.f32 %v1670_v55, %v981_v47  ;;  %v601_v58 = vadd.f32 %v537_v48, %v273_v40  ;;  %v857_v61 = vunpack.c.l.bf16 %v1029_v3 }
  0x6b   :  { %v275_v59 = vadd.f32 %v1651_v49, %v207_v51  ;;  %v208_v60 = vmul.f32 %v1637_v1, %v854_v52  ;;  %728 = vst [vmem:[%s1794_s6 + $0x188] sm:$0xff] %v664_v53  ;;  %v472_v0 = vmul.f32 %v1670_v55, %v982_v57  ;;  %v985_v2 = vunpack.c.l.bf16 %v1060_v7  ;;  %v1063_v51 = vld [vmem:[%s1791_s3 + $0xf0] sm:$0xff]  }
  0x6c   :  { %v602_v62 = vadd.f32 %v538_v54, %v274_v50  ;;  %v539_v63 = vadd.f32 %v1664_v10, %v471_v56  ;;  %v665_v5 = vmax.f32 %v601_v58, 0.0  ;;  %v209_v8 = vmul.f32 %v1637_v1, %v857_v61 }
  0x6d   :  { %v276_v6 = vadd.f32 %v1651_v49, %v208_v60  ;;  %v858_v9 = vunpack.c.h.bf16 %v1029_v3  ;;  %v540_v14 = vadd.f32 %v1664_v10, %v472_v0  ;;  %v473_v15 = vmul.f32 %v1670_v55, %v985_v2  ;;  %v1033_v60 = vld [vmem:[%s1788_s0 + $0xf8] sm:$0xff]  }
  0x6e   :  { %v666_v12 = vmax.f32 %v602_v62, 0.0  ;;  %v603_v13 = vadd.f32 %v539_v63, %v275_v59  ;;  %729 = vst [vmem:[%s1794_s6 + $0x190] sm:$0xff] %v665_v5  ;;  %v277_v16 = vadd.f32 %v1651_v49, %v209_v8  ;;  %v986_v18 = vunpack.c.h.bf16 %v1060_v7  ;;  %v1064_v2 = vld [vmem:[%s1791_s3 + $0xf8] sm:$0xff]  }
  0x6f   :  { %v210_v17 = vmul.f32 %v1637_v1, %v858_v9  ;;  %v861_v19 = vunpack.c.l.bf16 %v1030_v4  ;;  %v604_v21 = vadd.f32 %v540_v14, %v276_v6  ;;  %v541_v22 = vadd.f32 %v1664_v10, %v473_v15 }
  0x70   :  { %730 = vst [vmem:[%s1794_s6 + $0x198] sm:$0xff] %v666_v12  ;;  %v667_v20 = vmax.f32 %v603_v13, 0.0  ;;  %v989_v23 = vunpack.c.l.bf16 %v1061_v11  ;;  %v474_v26 = vmul.f32 %v1670_v55, %v986_v18  ;;  %v862_v28 = vunpack.c.h.bf16 %v1030_v4 }
  0x71   :  { %v278_v25 = vadd.f32 %v1651_v49, %v210_v17  ;;  %v211_v27 = vmul.f32 %v1637_v1, %v861_v19  ;;  %v668_v30 = vmax.f32 %v604_v21, 0.0  ;;  %v605_v31 = vadd.f32 %v541_v22, %v277_v16 }
  0x72   :  { %731 = vst [vmem:[%s1794_s6 + $0x1a0] sm:$0xff] %v667_v20  ;;  %v475_v32 = vmul.f32 %v1670_v55, %v989_v23  ;;  %v990_v33 = vunpack.c.h.bf16 %v1061_v11  ;;  %v542_v34 = vadd.f32 %v1664_v10, %v474_v26  ;;  %v212_v36 = vmul.f32 %v1637_v1, %v862_v28 }
  0x73   :  { %v279_v35 = vadd.f32 %v1651_v49, %v211_v27  ;;  %v865_v37 = vunpack.c.l.bf16 %v1031_v24  ;;  %732 = vst [vmem:[%s1794_s6 + $0x1a8] sm:$0xff] %v668_v30  ;;  %v669_v38 = vmax.f32 %v605_v31, 0.0  ;;  %v993_v41 = vunpack.c.l.bf16 %v1062_v29 }
  0x74   :  { %v543_v39 = vadd.f32 %v1664_v10, %v475_v32  ;;  %v476_v40 = vmul.f32 %v1670_v55, %v990_v33  ;;  %v606_v43 = vadd.f32 %v542_v34, %v278_v25  ;;  %v280_v44 = vadd.f32 %v1651_v49, %v212_v36 }
  0x75   :  { %v213_v45 = vmul.f32 %v1637_v1, %v865_v37  ;;  %v866_v46 = vunpack.c.h.bf16 %v1031_v24  ;;  %733 = vst [vmem:[%s1794_s6 + $0x1b0] sm:$0xff] %v669_v38  ;;  %v477_v48 = vmul.f32 %v1670_v55, %v993_v41  ;;  %v994_v50 = vunpack.c.h.bf16 %v1062_v29 }
  0x76   :  { %v607_v47 = vadd.f32 %v543_v39, %v279_v35  ;;  %v544_v3 = vadd.f32 %v1664_v10, %v476_v40  ;;  %v670_v52 = vmax.f32 %v606_v43, 0.0  ;;  %v869_v54 = vunpack.c.l.bf16 %v1032_v42 }
  0x77   :  { %v281_v7 = vadd.f32 %v1651_v49, %v213_v45  ;;  %v214_v53 = vmul.f32 %v1637_v1, %v866_v46  ;;  %v545_v58 = vadd.f32 %v1664_v10, %v477_v48  ;;  %v478_v59 = vmul.f32 %v1670_v55, %v994_v50 }
  0x78   :  { %v671_v56 = vmax.f32 %v607_v47, 0.0  ;;  %v608_v57 = vadd.f32 %v544_v3, %v280_v44  ;;  %734 = vst [vmem:[%s1794_s6 + $0x1b8] sm:$0xff] %v670_v52  ;;  %v215_v62 = vmul.f32 %v1637_v1, %v869_v54  ;;  %v997_v63 = vunpack.c.l.bf16 %v1063_v51 }
  0x79   :  { %v282_v61 = vadd.f32 %v1651_v49, %v214_v53  ;;  %v870_v0 = vunpack.c.h.bf16 %v1032_v42  ;;  %v609_v5 = vadd.f32 %v545_v58, %v281_v7  ;;  %v546_v6 = vadd.f32 %v1664_v10, %v478_v59 }
  0x7a   :  { %735 = vst [vmem:[%s1794_s6 + $0x1c0] sm:$0xff] %v671_v56  ;;  %v672_v4 = vmax.f32 %v608_v57, 0.0  ;;  %v998_v8 = vunpack.c.h.bf16 %v1063_v51  ;;  %v283_v9 = vadd.f32 %v1651_v49, %v215_v62  ;;  %v479_v11 = vmul.f32 %v1670_v55, %v997_v63 }
  0x7b   :  { %v216_v12 = vmul.f32 %v1637_v1, %v870_v0  ;;  %v873_v13 = vunpack.c.l.bf16 %v1033_v60  ;;  %v673_v14 = vmax.f32 %v609_v5, 0.0  ;;  %v610_v15 = vadd.f32 %v546_v6, %v282_v61 }
  0x7c   :  { %736 = vst [vmem:[%s1794_s6 + $0x1c8] sm:$0xff] %v672_v4  ;;  %v480_v16 = vmul.f32 %v1670_v55, %v998_v8  ;;  %v1001_v17 = vunpack.c.l.bf16 %v1064_v2  ;;  %v547_v18 = vadd.f32 %v1664_v10, %v479_v11  ;;  %v874_v21 = vunpack.c.h.bf16 %v1033_v60 }
  0x7d   :  { %v284_v19 = vadd.f32 %v1651_v49, %v216_v12  ;;  %v217_v20 = vmul.f32 %v1637_v1, %v873_v13  ;;  %737 = vst [vmem:[%s1794_s6 + $0x1d0] sm:$0xff] %v673_v14  ;;  %v674_v22 = vmax.f32 %v610_v15, 0.0  ;;  %v1002_v25 = vunpack.c.h.bf16 %v1064_v2 }
  0x7e   :  { %v548_v23 = vadd.f32 %v1664_v10, %v480_v16  ;;  %v481_v24 = vmul.f32 %v1670_v55, %v1001_v17  ;;  %v611_v26 = vadd.f32 %v547_v18, %v283_v9  ;;  %v218_v28 = vmul.f32 %v1637_v1, %v874_v21 }
  0x7f   :  { %v285_v27 = vadd.f32 %v1651_v49, %v217_v20  ;;  %738 = vst [vmem:[%s1794_s6 + $0x1d8] sm:$0xff] %v674_v22  ;;  %v482_v31 = vmul.f32 %v1670_v55, %v1002_v25 }
  0x80   :  { %v612_v29 = vadd.f32 %v548_v23, %v284_v19  ;;  %v549_v30 = vadd.f32 %v1664_v10, %v481_v24  ;;  %v675_v32 = vmax.f32 %v611_v26, 0.0  ;;  %v286_v33 = vadd.f32 %v1651_v49, %v218_v28 }
  0x81   :  { %v550_v36 = vadd.f32 %v1664_v10, %v482_v31 }
  0x82   :  { %v676_v34 = vmax.f32 %v612_v29, 0.0  ;;  %v613_v35 = vadd.f32 %v549_v30, %v285_v27  ;;  %739 = vst [vmem:[%s1794_s6 + $0x1e0] sm:$0xff] %v675_v32 }
  0x83   :  { %v614_v37 = vadd.f32 %v550_v36, %v286_v33 }
  0x84   :  { %740 = vst [vmem:[%s1794_s6 + $0x1e8] sm:$0xff] %v676_v34  ;;  %v677_v1 = vmax.f32 %v613_v35, 0.0 }
  0x85   :  { %v678_v55 = vmax.f32 %v614_v37, 0.0 }
  0x86   :  { %741 = vst [vmem:[%s1794_s6 + $0x1f0] sm:$0xff] %v677_v1 }
  0x87   :  { %742 = vst [vmem:[%s1794_s6 + $0x1f8] sm:$0xff] %v678_v55 }

</bundles_post_ra>
